<compile_context>
chip_gen: v7x
topology: tpu7x:2x2x1
jax: 0.10.0
libtpu: 0.0.40
codegen_flags: <defaults>
</compile_context>

<pallas_src>
import functools

import jax
import jax.numpy as jnp
from jax.experimental import pallas as pl
from jax.experimental.pallas import tpu as pltpu

HID = 32  # hidden width of the stand-in TransMorph flow head


# ----------------------------------------------------------------------------
# Fused FlowNet kernel: one batch element per grid step.
# ----------------------------------------------------------------------------
def _flownet_kernel(flow_ref, moving_ref, er_ref, ec_ref,
                    w1t_ref, b1_ref, w2t_ref, b2_ref,
                    flow2_ref, bi_ref, *, H, W, C):
    # flow_ref   : (1, 2, HW)    (row, col) displacement, HW lane-dense
    # moving_ref : (1, C*H, W)   moving image in row-major (C,H,W) layout
    # er_ref     : (HW, H)       E_r[s, h] = [s // W == h]  (constant 0/1)
    # ec_ref     : (HW, W)       E_c[s, w] = [s %  W == w]
    # w1t (HID,2)  b1 (HID,1)  w2t (2,HID)  b2 (2,1)    flow-head params
    # flow2_ref  : (1, 2, HW)
    # bi_ref     : (1, 2C, HW)   rows [0:C] = back, rows [C:2C] = inverse_warp
    HW = H * W
    f32 = jnp.float32

    # Per-output-pixel row/col ids, generated directly lane-dense (no reshape).
    p_id = jax.lax.broadcasted_iota(jnp.int32, (1, HW), 1).astype(f32)
    row_id = jnp.floor(p_id / W)
    col_id = p_id - row_id * W

    # Source row / source col index along the sublane axis of the separable
    # selection matrices (integer-valued, exact in f32 for these sizes).
    h_iota = jax.lax.broadcasted_iota(jnp.int32, (H, HW), 0).astype(f32)
    w_iota = jax.lax.broadcasted_iota(jnp.int32, (W, HW), 0).astype(f32)

    def sel_matrices(disp):
        # disp: (2, HW).  SpatialTransformer + grid_sample(align_corners=True):
        # the normalize/unnormalize cancel and new_locs[...,[1,0]] undoes the
        # x/y flip, so channel 0 is the ROW displacement and the sample point
        # for output pixel (i, j) is (i + dr, j + dc).
        # Returns R (H, HW), Cm (W, HW) with
        #   bilinear_weight[src=(h,w), out=p] = R[h, p] * Cm[w, p].
        r = row_id + disp[0:1, :]
        c = col_id + disp[1:2, :]
        r0 = jnp.floor(r)
        c0 = jnp.floor(c)
        fr = r - r0
        fc = c - c0

        def onehot(iota, idx, wgt):
            # zeros padding is implicit: an out-of-range corner index matches
            # no row of the iota, so that corner contributes 0.
            return jnp.where(iota == idx, wgt, 0.0)

        R = onehot(h_iota, r0, 1.0 - fr) + onehot(h_iota, r0 + 1.0, fr)
        Cm = onehot(w_iota, c0, 1.0 - fc) + onehot(w_iota, c0 + 1.0, fc)
        return R, Cm

    def separable_warp(src2d, R, Cm):
        # src2d (C*H, W) -> warped (C, HW):
        #   out[c, p] = sum_h R[h, p] * (sum_w src[c, h, w] * Cm[w, p])
        A = jnp.dot(src2d, Cm, preferred_element_type=f32)        # (C*H, HW)
        rows = [jnp.sum(A[ch * H:(ch + 1) * H, :] * R, axis=0, keepdims=True)
                for ch in range(C)]
        return rows[0] if C == 1 else jnp.concatenate(rows, axis=0)

    flow = flow_ref[0]          # (2, HW)
    moving2d = moving_ref[0]    # (C*H, W)

    # ---- Stage 1: warp = bilinear(moving, flow), fully separable -----------
    R1, C1 = sel_matrices(flow)
    warp = separable_warp(moving2d, R1, C1)                       # (C, HW)

    # ---- Stage 2: flow2 = per-pixel 2->HID->2 tanh MLP (TransMorph stand-in)
    # K=2 layer as two outer products (too small to be worth an MXU call).
    w1t = w1t_ref[...]                                            # (HID, 2)
    h = jnp.tanh(w1t[:, 0:1] * flow[0:1, :] + w1t[:, 1:2] * flow[1:2, :]
                 + b1_ref[...])                                   # (HID, HW)
    flow2 = (jnp.dot(w2t_ref[...], h, preferred_element_type=f32)
             + b2_ref[...])                                       # (2, HW)
    flow2_ref[0] = flow2

    # ---- Stage 3: back = bilinear(warp, flow2), inv = bilinear(moving, flow2)
    R2, C2 = sel_matrices(flow2)
    inv = separable_warp(moving2d, R2, C2)                        # (C, HW)
    # `warp` lives in (C, HW) lane layout, so resample it with the dense
    # mt2[s, p] = R2[s//W, p] * C2[s%W, p], expanded from the separable factors
    # on the (idle) MXU: two small 0/1 matmuls + ONE elementwise product,
    # instead of O(HW^2) compare/select passes on the VPU.
    # TODO(synk): demo-scale only; at 512x512 use a gather/DMA formulation.
    mt2 = (jnp.dot(er_ref[...], R2, preferred_element_type=f32) *
           jnp.dot(ec_ref[...], C2, preferred_element_type=f32))  # (HW, HW)
    back = jnp.dot(warp, mt2, preferred_element_type=f32)         # (C, HW)

    # Single lane-dense store of both warped outputs (split in the wrapper).
    bi_ref[0] = jnp.concatenate([back, inv], axis=0)              # (2C, HW)


def flownet_pallas(flow, moving, w1, b1, w2, b2):
    """Fused FlowNet forward. flow (B,2,H,W), moving (B,C,H,W)."""
    B, _, H, W = flow.shape
    C = moving.shape[1]
    HW = H * W
    hid = w1.shape[1]

    # HBM-side reinterpretations (free for contiguous NCHW): flow lane-dense on
    # HW, moving as the (C*H, W) LHS of the separable column contraction.
    flow_f = flow.astype(jnp.float32).reshape(B, 2, HW)
    moving2d = moving.astype(jnp.float32).reshape(B, C * H, W)
    w1t = w1.astype(jnp.float32).T                      # (HID, 2)
    b1c = b1.astype(jnp.float32).reshape(-1, 1)         # (HID, 1)
    w2t = w2.astype(jnp.float32).T                      # (2, HID)
    b2c = b2.astype(jnp.float32).reshape(-1, 1)         # (2, 1)

    # Constant 0/1 expansion matrices used in-kernel to build the dense mt2 on
    # the MXU from the separable row/col factors.
    s = jnp.arange(HW, dtype=jnp.int32)
    er = (s[:, None] // W == jnp.arange(H, dtype=jnp.int32)[None, :]
          ).astype(jnp.float32)                         # (HW, H)
    ec = (s[:, None] % W == jnp.arange(W, dtype=jnp.int32)[None, :]
          ).astype(jnp.float32)                         # (HW, W)

    kernel = functools.partial(_flownet_kernel, H=H, W=W, C=C)

    flow2, bi = pl.pallas_call(
        kernel,
        out_shape=(
            jax.ShapeDtypeStruct((B, 2, HW), jnp.float32),
            jax.ShapeDtypeStruct((B, 2 * C, HW), jnp.float32),
        ),
        grid=(B,),
        in_specs=[
            pl.BlockSpec((1, 2, HW), lambda b: (b, 0, 0)),
            pl.BlockSpec((1, C * H, W), lambda b: (b, 0, 0)),
            pl.BlockSpec((HW, H), lambda b: (0, 0)),
            pl.BlockSpec((HW, W), lambda b: (0, 0)),
            pl.BlockSpec((hid, 2), lambda b: (0, 0)),
            pl.BlockSpec((hid, 1), lambda b: (0, 0)),
            pl.BlockSpec((2, hid), lambda b: (0, 0)),
            pl.BlockSpec((2, 1), lambda b: (0, 0)),
        ],
        out_specs=(
            pl.BlockSpec((1, 2, HW), lambda b: (b, 0, 0)),
            pl.BlockSpec((1, 2 * C, HW), lambda b: (b, 0, 0)),
        ),
        compiler_params=pltpu.CompilerParams(
            # batch axis parallel -> keeps both v7x TensorCores busy when B>=2.
            dimension_semantics=("parallel",),
            vmem_limit_bytes=32 * 1024 * 1024,
        ),
    )(flow_f, moving2d, er, ec, w1t, b1c, w2t, b2c)

    back = bi[:, :C, :].reshape(B, C, H, W)
    inv = bi[:, C:, :].reshape(B, C, H, W)
    return flow2.reshape(B, 2, H, W), back, inv


@jax.jit
def flownet_forward(flow, moving, w1, b1, w2, b2):
    return flownet_pallas(flow, moving, w1, b1, w2, b2)


# ----------------------------------------------------------------------------
# Pure-JAX reference (for correctness check only).
# ----------------------------------------------------------------------------
def _warp_ref(src, flow):
    B, C, H, W = src.shape
    r = jnp.arange(H, dtype=jnp.float32)[None, :, None] + flow[:, 0]
    c = jnp.arange(W, dtype=jnp.float32)[None, None, :] + flow[:, 1]
    r0 = jnp.floor(r)
    c0 = jnp.floor(c)
    fr = r - r0
    fc = c - c0
    src_flat = src.reshape(B, C, H * W)

    def corner(ri, ci, w):
        valid = (ri >= 0) & (ri <= H - 1) & (ci >= 0) & (ci <= W - 1)
        idx = (jnp.clip(ri, 0, H - 1).astype(jnp.int32) * W
               + jnp.clip(ci, 0, W - 1).astype(jnp.int32)).reshape(B, 1, H * W)
        vals = jnp.take_along_axis(
            src_flat, jnp.broadcast_to(idx, (B, C, H * W)), axis=2)
        return vals.reshape(B, C, H, W) * (w * valid)[:, None]

    return (corner(r0, c0, (1 - fr) * (1 - fc)) +
            corner(r0, c0 + 1, (1 - fr) * fc) +
            corner(r0 + 1, c0, fr * (1 - fc)) +
            corner(r0 + 1, c0 + 1, fr * fc))


def _flow_head_ref(flow, w1, b1, w2, b2):
    B, _, H, W = flow.shape
    x = flow.transpose(0, 2, 3, 1).reshape(-1, 2)
    h = jnp.tanh(x @ w1 + b1)
    y = h @ w2 + b2
    return y.reshape(B, H, W, 2).transpose(0, 3, 1, 2)


if __name__ == "__main__":
    key = jax.random.PRNGKey(0)
    kf, km, k1, k2, k3, k4 = jax.random.split(key, 6)

    B, C, H, W = 2, 1, 16, 16
    moving = jax.random.uniform(km, (B, C, H, W), dtype=jnp.float32)
    flow = 2.0 * jax.random.normal(kf, (B, 2, H, W), dtype=jnp.float32)

    # deterministic stand-in flow-head parameters
    w1 = 0.5 * jax.random.normal(k1, (2, HID), dtype=jnp.float32)
    b1 = 0.1 * jax.random.normal(k2, (HID,), dtype=jnp.float32)
    w2 = 0.5 * jax.random.normal(k3, (HID, 2), dtype=jnp.float32)
    b2 = 0.1 * jax.random.normal(k4, (2,), dtype=jnp.float32)

    flow2, back, inverse_warp = flownet_forward(flow, moving, w1, b1, w2, b2)
    jax.block_until_ready((flow2, back, inverse_warp))

    assert flow2.shape == (B, 2, H, W)
    assert back.shape == (B, C, H, W)
    assert inverse_warp.shape == (B, C, H, W)

    # Correctness check against a pure-JAX reference of the same forward pass.
    warp_r = _warp_ref(moving, flow)
    flow2_r = _flow_head_ref(flow, w1, b1, w2, b2)
    back_r = _warp_ref(warp_r, flow2_r)
    inv_r = _warp_ref(moving, flow2_r)
    for name, got, want in (("flow2", flow2, flow2_r),
                            ("back", back, back_r),
                            ("inverse_warp", inverse_warp, inv_r)):
        err = float(jnp.max(jnp.abs(got - want)))
        assert err < 1e-3, f"{name} mismatch: max abs err = {err}"

    print("KERNEL_OK")
</pallas_src>

<mosaic_0001>
module attributes {stable_mosaic.version = 11 : i64} {
  func.func @_flownet_kernel(%arg0: i32, %arg1: memref<1x2x256xf32, #tpu.memory_space<vmem>>, %arg2: memref<1x16x16xf32, #tpu.memory_space<vmem>>, %arg3: memref<256x16xf32, #tpu.memory_space<vmem>>, %arg4: memref<256x16xf32, #tpu.memory_space<vmem>>, %arg5: memref<32x2xf32, #tpu.memory_space<vmem>>, %arg6: memref<32x1xf32, #tpu.memory_space<vmem>>, %arg7: memref<2x32xf32, #tpu.memory_space<vmem>>, %arg8: memref<2x1xf32, #tpu.memory_space<vmem>>, %arg9: memref<1x2x256xf32, #tpu.memory_space<vmem>>, %arg10: memref<1x2x256xf32, #tpu.memory_space<vmem>>) attributes {dimension_semantics = [#tpu.dimension_semantics<parallel>], iteration_bounds = array<i64: 2>, scalar_prefetch = 0 : i64, scratch_operands = 0 : i64, tpu.core_type = #tpu.core_type<tc>, window_params = [{transform_indices = @transform_0, window_bounds = array<i64: 1, 2, 256>}, {transform_indices = @transform_1, window_bounds = array<i64: 1, 16, 16>}, {pipeline_mode = #tpu.pipeline_mode<synchronous>, transform_indices = @transform_2, window_bounds = array<i64: 256, 16>}, {pipeline_mode = #tpu.pipeline_mode<synchronous>, transform_indices = @transform_3, window_bounds = array<i64: 256, 16>}, {pipeline_mode = #tpu.pipeline_mode<synchronous>, transform_indices = @transform_4, window_bounds = array<i64: 32, 2>}, {pipeline_mode = #tpu.pipeline_mode<synchronous>, transform_indices = @transform_5, window_bounds = array<i64: 32, 1>}, {pipeline_mode = #tpu.pipeline_mode<synchronous>, transform_indices = @transform_6, window_bounds = array<i64: 2, 32>}, {pipeline_mode = #tpu.pipeline_mode<synchronous>, transform_indices = @transform_7, window_bounds = array<i64: 2, 1>}, {transform_indices = @transform_8, window_bounds = array<i64: 1, 2, 256>}, {transform_indices = @transform_9, window_bounds = array<i64: 1, 2, 256>}]} {
    %0 = tpu.iota {dimensions = array<i32: 1>} : vector<1x256xi32>
    %1 = arith.sitofp %0 : vector<1x256xi32> to vector<1x256xf32>
    %cst = arith.constant 1.600000e+01 : f32
    %2 = vector.broadcast %cst : f32 to vector<1x256xf32>
    %3 = arith.divf %1, %2 : vector<1x256xf32>
    %4 = math.floor %3 : vector<1x256xf32>
    %cst_0 = arith.constant 1.600000e+01 : f32
    %5 = vector.broadcast %cst_0 : f32 to vector<1x256xf32>
    %6 = arith.mulf %4, %5 : vector<1x256xf32>
    %7 = arith.subf %1, %6 : vector<1x256xf32>
    %8 = tpu.iota {dimensions = array<i32: 0>} : vector<16x256xi32>
    %9 = arith.sitofp %8 : vector<16x256xi32> to vector<16x256xf32>
    %10 = tpu.iota {dimensions = array<i32: 0>} : vector<16x256xi32>
    %11 = arith.sitofp %10 : vector<16x256xi32> to vector<16x256xf32>
    %c0 = arith.constant 0 : index
    %c0_1 = arith.constant 0 : index
    %c0_2 = arith.constant 0 : index
    %12 = vector.load %arg1[%c0, %c0_1, %c0_2] : memref<1x2x256xf32, #tpu.memory_space<vmem>>, vector<1x2x256xf32>
    %13 = vector.shape_cast %12 : vector<1x2x256xf32> to vector<2x256xf32>
    %c0_3 = arith.constant 0 : index
    %c0_4 = arith.constant 0 : index
    %c0_5 = arith.constant 0 : index
    %14 = vector.load %arg2[%c0_3, %c0_4, %c0_5] : memref<1x16x16xf32, #tpu.memory_space<vmem>>, vector<1x16x16xf32>
    %15 = vector.shape_cast %14 : vector<1x16x16xf32> to vector<16x16xf32>
    %16 = vector.extract_strided_slice %13 {offsets = [0, 0], sizes = [1, 256], strides = [1, 1]} : vector<2x256xf32> to vector<1x256xf32>
    %17 = arith.addf %4, %16 : vector<1x256xf32>
    %18 = vector.extract_strided_slice %13 {offsets = [1, 0], sizes = [1, 256], strides = [1, 1]} : vector<2x256xf32> to vector<1x256xf32>
    %19 = arith.addf %7, %18 : vector<1x256xf32>
    %20 = math.floor %17 : vector<1x256xf32>
    %21 = math.floor %19 : vector<1x256xf32>
    %22 = arith.subf %17, %20 : vector<1x256xf32>
    %23 = arith.subf %19, %21 : vector<1x256xf32>
    %cst_6 = arith.constant 1.000000e+00 : f32
    %24 = vector.broadcast %cst_6 : f32 to vector<1x256xf32>
    %25 = arith.subf %24, %22 : vector<1x256xf32>
    %26 = vector.broadcast %20 : vector<1x256xf32> to vector<16x256xf32>
    %27 = arith.cmpf oeq, %9, %26 : vector<16x256xf32>
    %cst_7 = arith.constant 0.000000e+00 : f32
    %28 = vector.shape_cast %25 : vector<1x256xf32> to vector<1x256xf32>
    %29 = vector.broadcast %28 : vector<1x256xf32> to vector<16x256xf32>
    %30 = vector.broadcast %cst_7 : f32 to vector<16x256xf32>
    %31 = arith.select %27, %29, %30 : vector<16x256xi1>, vector<16x256xf32>
    %cst_8 = arith.constant 1.000000e+00 : f32
    %32 = vector.broadcast %cst_8 : f32 to vector<1x256xf32>
    %33 = arith.addf %20, %32 : vector<1x256xf32>
    %34 = vector.broadcast %33 : vector<1x256xf32> to vector<16x256xf32>
    %35 = arith.cmpf oeq, %9, %34 : vector<16x256xf32>
    %cst_9 = arith.constant 0.000000e+00 : f32
    %36 = vector.shape_cast %22 : vector<1x256xf32> to vector<1x256xf32>
    %37 = vector.broadcast %36 : vector<1x256xf32> to vector<16x256xf32>
    %38 = vector.broadcast %cst_9 : f32 to vector<16x256xf32>
    %39 = arith.select %35, %37, %38 : vector<16x256xi1>, vector<16x256xf32>
    %40 = arith.addf %31, %39 : vector<16x256xf32>
    %cst_10 = arith.constant 1.000000e+00 : f32
    %41 = vector.broadcast %cst_10 : f32 to vector<1x256xf32>
    %42 = arith.subf %41, %23 : vector<1x256xf32>
    %43 = vector.broadcast %21 : vector<1x256xf32> to vector<16x256xf32>
    %44 = arith.cmpf oeq, %11, %43 : vector<16x256xf32>
    %cst_11 = arith.constant 0.000000e+00 : f32
    %45 = vector.shape_cast %42 : vector<1x256xf32> to vector<1x256xf32>
    %46 = vector.broadcast %45 : vector<1x256xf32> to vector<16x256xf32>
    %47 = vector.broadcast %cst_11 : f32 to vector<16x256xf32>
    %48 = arith.select %44, %46, %47 : vector<16x256xi1>, vector<16x256xf32>
    %cst_12 = arith.constant 1.000000e+00 : f32
    %49 = vector.broadcast %cst_12 : f32 to vector<1x256xf32>
    %50 = arith.addf %21, %49 : vector<1x256xf32>
    %51 = vector.broadcast %50 : vector<1x256xf32> to vector<16x256xf32>
    %52 = arith.cmpf oeq, %11, %51 : vector<16x256xf32>
    %cst_13 = arith.constant 0.000000e+00 : f32
    %53 = vector.shape_cast %23 : vector<1x256xf32> to vector<1x256xf32>
    %54 = vector.broadcast %53 : vector<1x256xf32> to vector<16x256xf32>
    %55 = vector.broadcast %cst_13 : f32 to vector<16x256xf32>
    %56 = arith.select %52, %54, %55 : vector<16x256xi1>, vector<16x256xf32>
    %57 = arith.addf %48, %56 : vector<16x256xf32>
    %cst_14 = arith.constant dense<0.000000e+00> : vector<16x256xf32>
    %58 = tpu.matmul %15, %57, %cst_14 {dimension_numbers = #tpu.dot_dimension_numbers<[1], [0], [0], [1], [0, 0, 1, 1], [], []>} : vector<16x16xf32>, vector<16x256xf32>, vector<16x256xf32> -> vector<16x256xf32>
    %59 = arith.mulf %58, %40 : vector<16x256xf32>
    %cst_15 = arith.constant dense<0.000000e+00> : vector<256xf32>
    %60 = vector.multi_reduction <add>, %59, %cst_15 [0] : vector<16x256xf32> to vector<256xf32>
    %61 = vector.shape_cast %60 : vector<256xf32> to vector<1x256xf32>
    %c0_16 = arith.constant 0 : index
    %c0_17 = arith.constant 0 : index
    %62 = vector.load %arg5[%c0_16, %c0_17] : memref<32x2xf32, #tpu.memory_space<vmem>>, vector<32x2xf32>
    %63 = vector.extract_strided_slice %62 {offsets = [0, 0], sizes = [32, 1], strides = [1, 1]} : vector<32x2xf32> to vector<32x1xf32>
    %64 = vector.extract_strided_slice %13 {offsets = [0, 0], sizes = [1, 256], strides = [1, 1]} : vector<2x256xf32> to vector<1x256xf32>
    %65 = vector.broadcast %63 : vector<32x1xf32> to vector<32x256xf32>
    %66 = vector.broadcast %64 : vector<1x256xf32> to vector<32x256xf32>
    %67 = arith.mulf %65, %66 : vector<32x256xf32>
    %68 = vector.extract_strided_slice %62 {offsets = [0, 1], sizes = [32, 1], strides = [1, 1]} : vector<32x2xf32> to vector<32x1xf32>
    %69 = vector.extract_strided_slice %13 {offsets = [1, 0], sizes = [1, 256], strides = [1, 1]} : vector<2x256xf32> to vector<1x256xf32>
    %70 = vector.broadcast %68 : vector<32x1xf32> to vector<32x256xf32>
    %71 = vector.broadcast %69 : vector<1x256xf32> to vector<32x256xf32>
    %72 = arith.mulf %70, %71 : vector<32x256xf32>
    %73 = arith.addf %67, %72 : vector<32x256xf32>
    %c0_18 = arith.constant 0 : index
    %c0_19 = arith.constant 0 : index
    %74 = vector.load %arg6[%c0_18, %c0_19] : memref<32x1xf32, #tpu.memory_space<vmem>>, vector<32x1xf32>
    %75 = vector.broadcast %74 : vector<32x1xf32> to vector<32x256xf32>
    %76 = arith.addf %73, %75 : vector<32x256xf32>
    %77 = math.tanh %76 : vector<32x256xf32>
    %c0_20 = arith.constant 0 : index
    %c0_21 = arith.constant 0 : index
    %78 = vector.load %arg7[%c0_20, %c0_21] : memref<2x32xf32, #tpu.memory_space<vmem>>, vector<2x32xf32>
    %cst_22 = arith.constant dense<0.000000e+00> : vector<2x256xf32>
    %79 = tpu.matmul %78, %77, %cst_22 {dimension_numbers = #tpu.dot_dimension_numbers<[1], [0], [0], [1], [0, 0, 1, 1], [], []>} : vector<2x32xf32>, vector<32x256xf32>, vector<2x256xf32> -> vector<2x256xf32>
    %c0_23 = arith.constant 0 : index
    %c0_24 = arith.constant 0 : index
    %80 = vector.load %arg8[%c0_23, %c0_24] : memref<2x1xf32, #tpu.memory_space<vmem>>, vector<2x1xf32>
    %81 = vector.broadcast %80 : vector<2x1xf32> to vector<2x256xf32>
    %82 = arith.addf %79, %81 : vector<2x256xf32>
    %c0_25 = arith.constant 0 : index
    %c0_26 = arith.constant 0 : index
    %c0_27 = arith.constant 0 : index
    %83 = vector.load %arg9[%c0_25, %c0_26, %c0_27] : memref<1x2x256xf32, #tpu.memory_space<vmem>>, vector<1x2x256xf32>
    %84 = vector.shape_cast %83 : vector<1x2x256xf32> to vector<2x256xf32>
    %85 = vector.shape_cast %82 : vector<2x256xf32> to vector<1x2x256xf32>
    tpu.vector_store %arg9[%c0_25, %c0_26, %c0_27], %85 {strides = array<i32>} : memref<1x2x256xf32, #tpu.memory_space<vmem>>, vector<1x2x256xf32>,
    %86 = vector.extract_strided_slice %82 {offsets = [0, 0], sizes = [1, 256], strides = [1, 1]} : vector<2x256xf32> to vector<1x256xf32>
    %87 = arith.addf %4, %86 : vector<1x256xf32>
    %88 = vector.extract_strided_slice %82 {offsets = [1, 0], sizes = [1, 256], strides = [1, 1]} : vector<2x256xf32> to vector<1x256xf32>
    %89 = arith.addf %7, %88 : vector<1x256xf32>
    %90 = math.floor %87 : vector<1x256xf32>
    %91 = math.floor %89 : vector<1x256xf32>
    %92 = arith.subf %87, %90 : vector<1x256xf32>
    %93 = arith.subf %89, %91 : vector<1x256xf32>
    %cst_28 = arith.constant 1.000000e+00 : f32
    %94 = vector.broadcast %cst_28 : f32 to vector<1x256xf32>
    %95 = arith.subf %94, %92 : vector<1x256xf32>
    %96 = vector.broadcast %90 : vector<1x256xf32> to vector<16x256xf32>
    %97 = arith.cmpf oeq, %9, %96 : vector<16x256xf32>
    %cst_29 = arith.constant 0.000000e+00 : f32
    %98 = vector.shape_cast %95 : vector<1x256xf32> to vector<1x256xf32>
    %99 = vector.broadcast %98 : vector<1x256xf32> to vector<16x256xf32>
    %100 = vector.broadcast %cst_29 : f32 to vector<16x256xf32>
    %101 = arith.select %97, %99, %100 : vector<16x256xi1>, vector<16x256xf32>
    %cst_30 = arith.constant 1.000000e+00 : f32
    %102 = vector.broadcast %cst_30 : f32 to vector<1x256xf32>
    %103 = arith.addf %90, %102 : vector<1x256xf32>
    %104 = vector.broadcast %103 : vector<1x256xf32> to vector<16x256xf32>
    %105 = arith.cmpf oeq, %9, %104 : vector<16x256xf32>
    %cst_31 = arith.constant 0.000000e+00 : f32
    %106 = vector.shape_cast %92 : vector<1x256xf32> to vector<1x256xf32>
    %107 = vector.broadcast %106 : vector<1x256xf32> to vector<16x256xf32>
    %108 = vector.broadcast %cst_31 : f32 to vector<16x256xf32>
    %109 = arith.select %105, %107, %108 : vector<16x256xi1>, vector<16x256xf32>
    %110 = arith.addf %101, %109 : vector<16x256xf32>
    %cst_32 = arith.constant 1.000000e+00 : f32
    %111 = vector.broadcast %cst_32 : f32 to vector<1x256xf32>
    %112 = arith.subf %111, %93 : vector<1x256xf32>
    %113 = vector.broadcast %91 : vector<1x256xf32> to vector<16x256xf32>
    %114 = arith.cmpf oeq, %11, %113 : vector<16x256xf32>
    %cst_33 = arith.constant 0.000000e+00 : f32
    %115 = vector.shape_cast %112 : vector<1x256xf32> to vector<1x256xf32>
    %116 = vector.broadcast %115 : vector<1x256xf32> to vector<16x256xf32>
    %117 = vector.broadcast %cst_33 : f32 to vector<16x256xf32>
    %118 = arith.select %114, %116, %117 : vector<16x256xi1>, vector<16x256xf32>
    %cst_34 = arith.constant 1.000000e+00 : f32
    %119 = vector.broadcast %cst_34 : f32 to vector<1x256xf32>
    %120 = arith.addf %91, %119 : vector<1x256xf32>
    %121 = vector.broadcast %120 : vector<1x256xf32> to vector<16x256xf32>
    %122 = arith.cmpf oeq, %11, %121 : vector<16x256xf32>
    %cst_35 = arith.constant 0.000000e+00 : f32
    %123 = vector.shape_cast %93 : vector<1x256xf32> to vector<1x256xf32>
    %124 = vector.broadcast %123 : vector<1x256xf32> to vector<16x256xf32>
    %125 = vector.broadcast %cst_35 : f32 to vector<16x256xf32>
    %126 = arith.select %122, %124, %125 : vector<16x256xi1>, vector<16x256xf32>
    %127 = arith.addf %118, %126 : vector<16x256xf32>
    %cst_36 = arith.constant dense<0.000000e+00> : vector<16x256xf32>
    %128 = tpu.matmul %15, %127, %cst_36 {dimension_numbers = #tpu.dot_dimension_numbers<[1], [0], [0], [1], [0, 0, 1, 1], [], []>} : vector<16x16xf32>, vector<16x256xf32>, vector<16x256xf32> -> vector<16x256xf32>
    %129 = arith.mulf %128, %110 : vector<16x256xf32>
    %cst_37 = arith.constant dense<0.000000e+00> : vector<256xf32>
    %130 = vector.multi_reduction <add>, %129, %cst_37 [0] : vector<16x256xf32> to vector<256xf32>
    %131 = vector.shape_cast %130 : vector<256xf32> to vector<1x256xf32>
    %c0_38 = arith.constant 0 : index
    %c0_39 = arith.constant 0 : index
    %132 = vector.load %arg3[%c0_38, %c0_39] : memref<256x16xf32, #tpu.memory_space<vmem>>, vector<256x16xf32>
    %cst_40 = arith.constant dense<0.000000e+00> : vector<256x256xf32>
    %133 = tpu.matmul %132, %110, %cst_40 {dimension_numbers = #tpu.dot_dimension_numbers<[1], [0], [0], [1], [0, 0, 1, 1], [], []>} : vector<256x16xf32>, vector<16x256xf32>, vector<256x256xf32> -> vector<256x256xf32>
    %c0_41 = arith.constant 0 : index
    %c0_42 = arith.constant 0 : index
    %134 = vector.load %arg4[%c0_41, %c0_42] : memref<256x16xf32, #tpu.memory_space<vmem>>, vector<256x16xf32>
    %cst_43 = arith.constant dense<0.000000e+00> : vector<256x256xf32>
    %135 = tpu.matmul %134, %127, %cst_43 {dimension_numbers = #tpu.dot_dimension_numbers<[1], [0], [0], [1], [0, 0, 1, 1], [], []>} : vector<256x16xf32>, vector<16x256xf32>, vector<256x256xf32> -> vector<256x256xf32>
    %136 = arith.mulf %133, %135 : vector<256x256xf32>
    %cst_44 = arith.constant dense<0.000000e+00> : vector<1x256xf32>
    %137 = tpu.matmul %61, %136, %cst_44 {dimension_numbers = #tpu.dot_dimension_numbers<[1], [0], [0], [1], [0, 0, 1, 1], [], []>} : vector<1x256xf32>, vector<256x256xf32>, vector<1x256xf32> -> vector<1x256xf32>
    %138 = tpu.concatenate %137, %131 in 0 : vector<1x256xf32>, vector<1x256xf32> -> vector<2x256xf32>
    %c0_45 = arith.constant 0 : index
    %c0_46 = arith.constant 0 : index
    %c0_47 = arith.constant 0 : index
    %139 = vector.load %arg10[%c0_45, %c0_46, %c0_47] : memref<1x2x256xf32, #tpu.memory_space<vmem>>, vector<1x2x256xf32>
    %140 = vector.shape_cast %139 : vector<1x2x256xf32> to vector<2x256xf32>
    %141 = vector.shape_cast %138 : vector<2x256xf32> to vector<1x2x256xf32>
    tpu.vector_store %arg10[%c0_45, %c0_46, %c0_47], %141 {strides = array<i32>} : memref<1x2x256xf32, #tpu.memory_space<vmem>>, vector<1x2x256xf32>,
    return
  }
  func.func @transform_0(%arg0: i32) -> (i32, i32, i32) {
    %c0_i32 = arith.constant 0 : i32
    %c0_i32_0 = arith.constant 0 : i32
    %c0_i32_1 = arith.constant 0 : i32
    return %arg0, %c0_i32, %c0_i32_0 : i32, i32, i32
  }
  func.func @transform_1(%arg0: i32) -> (i32, i32, i32) {
    %c0_i32 = arith.constant 0 : i32
    %c0_i32_0 = arith.constant 0 : i32
    %c0_i32_1 = arith.constant 0 : i32
    return %arg0, %c0_i32, %c0_i32_0 : i32, i32, i32
  }
  func.func @transform_2(%arg0: i32) -> (i32, i32) {
    %c0_i32 = arith.constant 0 : i32
    %c0_i32_0 = arith.constant 0 : i32
    %c0_i32_1 = arith.constant 0 : i32
    return %c0_i32, %c0_i32_0 : i32, i32
  }
  func.func @transform_3(%arg0: i32) -> (i32, i32) {
    %c0_i32 = arith.constant 0 : i32
    %c0_i32_0 = arith.constant 0 : i32
    %c0_i32_1 = arith.constant 0 : i32
    return %c0_i32, %c0_i32_0 : i32, i32
  }
  func.func @transform_4(%arg0: i32) -> (i32, i32) {
    %c0_i32 = arith.constant 0 : i32
    %c0_i32_0 = arith.constant 0 : i32
    %c0_i32_1 = arith.constant 0 : i32
    return %c0_i32, %c0_i32_0 : i32, i32
  }
  func.func @transform_5(%arg0: i32) -> (i32, i32) {
    %c0_i32 = arith.constant 0 : i32
    %c0_i32_0 = arith.constant 0 : i32
    %c0_i32_1 = arith.constant 0 : i32
    return %c0_i32, %c0_i32_0 : i32, i32
  }
  func.func @transform_6(%arg0: i32) -> (i32, i32) {
    %c0_i32 = arith.constant 0 : i32
    %c0_i32_0 = arith.constant 0 : i32
    %c0_i32_1 = arith.constant 0 : i32
    return %c0_i32, %c0_i32_0 : i32, i32
  }
  func.func @transform_7(%arg0: i32) -> (i32, i32) {
    %c0_i32 = arith.constant 0 : i32
    %c0_i32_0 = arith.constant 0 : i32
    %c0_i32_1 = arith.constant 0 : i32
    return %c0_i32, %c0_i32_0 : i32, i32
  }
  func.func @transform_8(%arg0: i32) -> (i32, i32, i32) {
    %c0_i32 = arith.constant 0 : i32
    %c0_i32_0 = arith.constant 0 : i32
    %c0_i32_1 = arith.constant 0 : i32
    return %arg0, %c0_i32, %c0_i32_0 : i32, i32, i32
  }
  func.func @transform_9(%arg0: i32) -> (i32, i32, i32) {
    %c0_i32 = arith.constant 0 : i32
    %c0_i32_0 = arith.constant 0 : i32
    %c0_i32_1 = arith.constant 0 : i32
    return %arg0, %c0_i32, %c0_i32_0 : i32, i32, i32
  }
}

</mosaic_0001>

<bundles_post_ra>
// kernel: flownet_forward.1
= control target key start
LH: loop header
LB: loop body
LE: loop exit
PB: predicated region body
PF: predicated region fallthrough
CT: control target
= control target key end

     0   :  { %s2360_s30 = smov 0   ;;  %s2909_s0 = inlined_call_operand.vmem [shape: f32[2,2,256], index: 0, kind: input, shape index: {}]   ;;  %s2910_s1 = inlined_call_operand.vmem [shape: f32[2,16,16], index: 1, kind: input, shape index: {}]   ;;  %s2911_s2 = inlined_call_operand.vmem [shape: f32[256,16], index: 2, kind: input, shape index: {}]   ;;  %s2912_s3 = inlined_call_operand.vmem [shape: f32[256,16], index: 3, kind: input, shape index: {}]   ;;  %s2913_s4 = inlined_call_operand.vmem [shape: f32[32,2], index: 4, kind: input, shape index: {}]   ;;  %s2914_s5 = inlined_call_operand.vmem [shape: f32[32,1], index: 5, kind: input, shape index: {}]   ;;  %s2915_s6 = inlined_call_operand.vmem [shape: f32[2,32], index: 6, kind: input, shape index: {}]   ;;  %s2916_s7 = inlined_call_operand.vmem [shape: f32[2,1], index: 7, kind: input, shape index: {}]   ;;  %s2917_s8 = inlined_call_operand.vmem [shape: f32[2,2,256], index: 8, kind: output, shape index: {0}]   ;;  %s2918_s9 = inlined_call_operand.vmem [shape: f32[2,2,256], index: 9, kind: output, shape index: {1}]  }
   0x1 LB: > { %s2088_s10 = sadd.s32 4294967295, %s2305_s30   ;;  %p2092_p0 = scmp.ge.s32.totalorder %s2305_s30, 1  ;;  %s2305_s30 = sphi %s2360_s30, %s20_s30  }
   0x2   : > { %p300_p1 = scmp.lt.s32.totalorder %s2305_s30, 3 }
   0x4   : > { %p301_p2 = pnand %p2092_p0, %p300_p1 }
   0x5   : > { %v637_v0 = vld [vmem:[%s2913_s4 + $0x10] sm:$0xff] (!%p301_p2)  ;;  %v635_v1 = vld [vmem:[%s2913_s4] sm:$0xff] (!%p301_p2)  ;;  %p346_p3 = scmp.lt.s32.totalorder (!%p301_p2), %s2088_s10, 1  ;;  %v366_v2 = vlaneseq (!%p301_p2)  ;;  %v2307_v3 = vmov (!%p301_p2), 1   ;;  %v636_v4 = vld [vmem:[%s2913_s4 + $0x8] sm:$0xff] (!%p301_p2)  ;;  %v2308_v7 = vmov (!%p301_p2), 0  }
   0x6   : > { %304 = sbr.rel (%p301_p2) target bundleno = 993 (0x3e1), region = 52  ;;  %2279 = vset.pattern.permute.xlu0 (!%p301_p2), %v2307_v3  ;;  %2277 = vset.pattern.permute.xlu1 (!%p301_p2), %v2307_v3  ;;  %v638_v10 = vld [vmem:[%s2913_s4 + $0x18] sm:$0xff] (!%p301_p2)  ;;  %v716_v11 = vld [vmem:[%s2914_s5 + $0x8] sm:$0xff] (!%p301_p2)  ;;  %v715_v12 = vld [vmem:[%s2914_s5] sm:$0xff] (!%p301_p2)  ;;  %v2309_v16 = vmov (!%p301_p2), 0.0   ;;  %vm762_vm4 = vcmask (!%p301_p2), 261120  }
   0x7   : > { %684 = vperm.xlu0 (!%p301_p2), %2279, %v637_v0   ;;  %676 = vperm.xlu1 (!%p301_p2), %2277, %v635_v1   ;;  %v2379_v5 = vshrl.u32 (!%p301_p2), %v366_v2, 7  ;;  %v756_v13 = vld [vmem:[%s2916_s7] sm:$0x3] (!%p301_p2)  ;;  %v717_v14 = vld [vmem:[%s2914_s5 + $0x10] sm:$0xff] (!%p301_p2)  ;;  %v718_v15 = vld [vmem:[%s2914_s5 + $0x18] sm:$0xff] (!%p301_p2)  ;;  %v2414_v17 = vand.u32 (!%p301_p2), 127, %v366_v2 }
   0x8   : > { %830 = vmatprep.mubr.f32.mxu1 (!%p301_p2), %v2309_v16  ;;  %604 = vmatprep.mubr.f32.mxu0 (!%p301_p2), %v2309_v16  ;;  %vm533_vm9 = vcmask (!%p301_p2), 130048  }
   0x9   : > { %v395_v6 = vsub.s32 (!%p301_p2), 2, %v2379_v5  ;;  %v368_v18 = vadd.s32 (!%p301_p2), 128, %v2414_v17  ;;  %v407_v21 = vsub.s32 (!%p301_p2), 3, %v2379_v5  ;;  %v382_v26 = vadd.s32 (!%p301_p2), 8, %v2379_v5 }
   0xa   : > { %v2427_v28 = vsub.s32 (!%p301_p2), 0, %v2379_v5  ;;  %v2430_v30 = vcvt.s32.f32 (!%p301_p2), %v2379_v5  ;;  %v2443_v48 = vsub.s32 (!%p301_p2), 1, %v2379_v5 }
   0xb   : > { %2280 = vset.pattern.permute.xlu0 (!%p301_p2), %v2308_v7  ;;  %680 = vperm.xlu1 (!%p301_p2), %2277, %v636_v4   ;;  %v370_v19 = vcvt.s32.f32 (!%p301_p2), %v368_v18  ;;  %v2432_v31 = vcvt.s32.f32 (!%p301_p2), %v382_v26 }
   0xc   : > { %641 = vperm.xlu0 (!%p301_p2), %2280, %v635_v1  }
   0xd   : > { %s2920_s10 = smov (!%p346_p3, %s2088_s10), 1  ;;  %v373_v20 = vmul.f32 0.0625, %v370_v19 }
   0xe   : > { %s2382_s17 = sshll.u32 %s2920_s10, 2  ;;  %s2175_s16 = sshll.u32 %s2920_s10, 4 }
   0xf   : > { %s350_s20 = scalar_lea.vmem %s2909_s0, %s2382_s17  ;;  %2278 = vset.pattern.permute.xlu1 %v2308_v7  ;;  %v2418_v22 = vfloor.f32 %v373_v20  ;;  %s360_s22 = scalar_lea.vmem %s2917_s8, %s2382_s17 }
  0x10   : > { %v2389_v8 = vld [vmem:[%s350_s20] sm:$0xf]  ;;  %646 = vperm.xlu0 %2280, %v636_v4   ;;  %656 = vperm.xlu1 %2278, %v638_v10   ;;  %s355_s20 = scalar_lea.vmem %s2910_s1, %s2175_s16  ;;  %s365_s10 = scalar_lea.vmem %s2918_s9, %s2382_s17 }
  0x11   : > { %v2392_v9 = vrot.slane %v2389_v8, %v395_v6  ;;  %v377_v23 = vmul.f32 16.0, %v2418_v22  ;;  %v408_v24 = vrot.slane %v2389_v8, %v407_v21  ;;  %v2447_v51 = vrot.slane %v2389_v8, %v2427_v28 }
  0x12   : > { %v2451_v52 = vrot.slane %v2389_v8, %v2443_v48 }
  0x13   : > { %v2422_v25 = vsub.f32 %v370_v19, %v377_v23  ;;  %v662_v53 = vrot.slane %v2447_v51, %v2427_v28  ;;  %v666_v56 = vrot.slane %v2392_v9, %v2427_v28  ;;  %v698_v58 = vrot.slane %v408_v24, %v2443_v48 }
  0x14   : > { %651 = vperm.xlu0 %2280, %v637_v0   ;;  %2281 = vset.pattern.permute.xlu1 %v2307_v3  ;;  %v694_v57 = vrot.slane %v2451_v52, %v2443_v48 }
  0x15   : > { %688 = vperm.xlu1 %2281, %v638_v10   ;;  %v412_v27 = vadd.f32 %v408_v24, %v2422_v25 }
  0x17   : > { %v416_v29 = vfloor.f32 %v412_v27 }
  0x18   : > { %726 = vperm.xlu0 %2280, %v716_v11  }
  0x19   : > { %2282 = vset.pattern.permute.xlu1 %v2308_v7  ;;  %v420_v32 = vsub.f32 %v412_v27, %v416_v29  ;;  %v486_v33 = vrot.slane %v416_v29, %v2427_v28  ;;  %v504_v34 = vadd.f32 1.0, %v416_v29 }
  0x1a   : > { %721 = vperm.xlu1 %2282, %v715_v12  }
  0x1b   : > { %v478_v35 = vsub.f32 1.0, %v420_v32  ;;  %v512_v36 = vrot.slane %v504_v34, %v2427_v28  ;;  %vm488_vm0 = vcmp.eq.f32.partialorder %v2430_v30, %v486_v33  ;;  %vm490_vm1 = vcmp.eq.f32.partialorder %v2432_v31, %v486_v33 }
  0x1c   : > { %759 = vperm.xlu0 %2280, %v756_v13   ;;  %v524_v37 = vrot.slane %v420_v32, %v2427_v28 }
  0x1d   : > { %v498_v38 = vrot.slane %v478_v35, %v2427_v28  ;;  %vm514_vm2 = vcmp.eq.f32.partialorder %v2430_v30, %v512_v36  ;;  %vm516_vm3 = vcmp.eq.f32.partialorder %v2432_v31, %v512_v36 }
  0x1e   : > { %731 = vperm.xlu1 %2282, %v717_v14   ;;  %v526_v39 = vsel %vm514_vm2, %v524_v37, 0.0  ;;  %v528_v40 = vsel %vm516_vm3, %v524_v37, 0.0 }
  0x1f   : > { %v500_v41 = vsel %vm488_vm0, %v498_v38, 0.0  ;;  %v502_v42 = vsel %vm490_vm1, %v498_v38, 0.0 }
  0x20   : > { %v530_v43 = vadd.f32 %v526_v39, %v500_v41  ;;  %v532_v44 = vadd.f32 %v528_v40, %v502_v42 }
  0x22   : > { %736 = vperm.xlu1 %2282, %v718_v15   ;;  %v2178_v45 = vpack.c.bf16 %v532_v44, %v530_v43 }
  0x24   : > { %2179 = vmatprep.subr.bf16.mxu0 %v2178_v45 }
  0x86   : > { %v677_v46 = vpop.permute.xlu1 %676  ;;  %v685_v47 = vpop.permute.xlu0 %684 }
  0x87   : > { %v699_v3 = vmul.f32 %v694_v57, %v677_v46  ;;  %v700_v4 = vmul.f32 %v698_v58, %v677_v46  ;;  %v703_v18 = vmul.f32 %v694_v57, %v685_v47  ;;  %v704_v21 = vmul.f32 %v698_v58, %v685_v47 }
  0x8a   : > { %v681_v49 = vpop.permute.xlu1 %680 }
  0x8b   : > { %v642_v50 = vpop.permute.xlu0 %641  ;;  %v701_v63 = vmul.f32 %v694_v57, %v681_v49  ;;  %v702_v0 = vmul.f32 %v698_v58, %v681_v49 }
  0x8c   : > { %v667_v61 = vmul.f32 %v662_v53, %v642_v50  ;;  %v668_v1 = vmul.f32 %v666_v56, %v642_v50 }
  0x8e   : > { %v707_v8 = vadd.f32 %v699_v3, %v667_v61  ;;  %v708_v13 = vadd.f32 %v700_v4, %v668_v1 }
  0x8f   : > { %v647_v54 = vpop.permute.xlu0 %646  ;;  %v657_v55 = vpop.permute.xlu1 %656 }
  0x90   : > { %v669_v59 = vmul.f32 %v662_v53, %v647_v54  ;;  %v670_v60 = vmul.f32 %v666_v56, %v647_v54  ;;  %v673_v32 = vmul.f32 %v662_v53, %v657_v55  ;;  %v674_v33 = vmul.f32 %v666_v56, %v657_v55 }
  0x92   : > { %v709_v5 = vadd.f32 %v701_v63, %v669_v59  ;;  %v710_v6 = vadd.f32 %v702_v0, %v670_v60 }
  0x93   : > { %v652_v62 = vpop.permute.xlu0 %651 }
  0x94   : > { %v689_v2 = vpop.permute.xlu1 %688  ;;  %v671_v10 = vmul.f32 %v662_v53, %v652_v62  ;;  %v672_v14 = vmul.f32 %v666_v56, %v652_v62  ;;  %v755_v56 = vld [vmem:[%s2915_s6] sm:$0x3] }
  0x95   : > { %v705_v23 = vmul.f32 %v694_v57, %v689_v2  ;;  %v706_v24 = vmul.f32 %v698_v58, %v689_v2  ;;  %v369_v57 = vcvt.s32.f32 %v2414_v17 }
  0x96   : > { %v711_v26 = vadd.f32 %v703_v18, %v671_v10  ;;  %v712_v29 = vadd.f32 %v704_v21, %v672_v14  ;;  %v2486_v14 = vld [vmem:[%s355_s20 + $0x8] sm:$0xff] }
  0x97   : > { %v727_v7 = vpop.permute.xlu0 %726  ;;  %v713_v36 = vadd.f32 %v705_v23, %v673_v32  ;;  %v714_v37 = vadd.f32 %v706_v24, %v674_v33  ;;  %v372_v58 = vmul.f32 0.0625, %v369_v57 }
  0x98   : > { %v741_v11 = vadd.f32 %v727_v7, %v709_v5  ;;  %v742_v12 = vadd.f32 %v727_v7, %v710_v6 }
  0x99   : > { %v722_v15 = vpop.permute.xlu1 %721  ;;  %v2465_v59 = vfloor.f32 %v372_v58 }
  0x9a   : > { %2283 = vtanh.f32 %v741_v11  ;;  %v739_v19 = vadd.f32 %v722_v15, %v707_v8  ;;  %v740_v20 = vadd.f32 %v722_v15, %v708_v13  ;;  %v2481_v13 = vld [vmem:[%s355_s20] sm:$0xff] }
  0x9b   : > { %2285 = vtanh.f32 %v742_v12  ;;  %v376_v60 = vmul.f32 16.0, %v2465_v59  ;;  %v760_v15 = vpop.permute.xlu0 %759 }
  0x9c   : > { %2287 = vtanh.f32 %v739_v19 }
  0x9d   : > { %2289 = vtanh.f32 %v740_v20  ;;  %v732_v27 = vpop.permute.xlu1 %731  ;;  %v378_v61 = vsub.f32 %v369_v57, %v376_v60 }
  0x9e   : > { %v743_v34 = vadd.f32 %v732_v27, %v711_v26  ;;  %v744_v35 = vadd.f32 %v732_v27, %v712_v29 }
  0x9f   : > { %v411_v62 = vadd.f32 %v2451_v52, %v378_v61 }
  0xa0   : > { %2291 = vtanh.f32 %v743_v34 }
  0xa1   : > { %v737_v38 = vpop.permute.xlu1 %736  ;;  %2293 = vtanh.f32 %v744_v35  ;;  %v415_v63 = vfloor.f32 %v411_v62 }
  0xa2   : > { %v745_v39 = vadd.f32 %v737_v38, %v713_v36  ;;  %v746_v40 = vadd.f32 %v737_v38, %v714_v37 }
  0xa3   : > { %v419_v0 = vsub.f32 %v411_v62, %v415_v63  ;;  %v503_v1 = vadd.f32 1.0, %v415_v63  ;;  %v482_v3 = vrot.slane %v415_v63, %v2427_v28 }
  0xa4   : > { %v2284_v41 = vpop.eup %2283  ;;  %2295 = vtanh.f32 %v745_v39 }
  0xa5   : > { %v2286_v42 = vpop.eup %2285  ;;  %2297 = vtanh.f32 %v746_v40  ;;  %v477_v2 = vsub.f32 1.0, %v419_v0  ;;  %v508_v4 = vrot.slane %v503_v1, %v2427_v28  ;;  %v520_v17 = vrot.slane %v419_v0, %v2427_v28 }
  0xa6   : > { %v2288_v43 = vpop.eup %2287  ;;  %vm487_vm5 = vcmp.eq.f32.partialorder %v2430_v30, %v482_v3  ;;  %vm489_vm6 = vcmp.eq.f32.partialorder %v2432_v31, %v482_v3 }
  0xa7   : > { %v2290_v44 = vpop.eup %2289  ;;  %v2184_v45 = vpack.c.bf16 %v2284_v41, %v2288_v43  ;;  %v494_v5 = vrot.slane %v477_v2, %v2427_v28  ;;  %vm513_vm7 = vcmp.eq.f32.partialorder %v2430_v30, %v508_v4  ;;  %vm515_vm8 = vcmp.eq.f32.partialorder %v2432_v31, %v508_v4 }
  0xa8   : > { %v2182_v46 = vpack.c.bf16 %v2286_v42, %v2290_v44  ;;  %v525_v7 = vsel %vm513_vm7, %v520_v17, 0.0  ;;  %v527_v8 = vsel %vm515_vm8, %v520_v17, 0.0 }
  0xa9   : > { %v499_v52 = vsel %vm487_vm5, %v494_v5, 0.0  ;;  %v501_v6 = vsel %vm489_vm6, %v494_v5, 0.0 }
  0xaa   : > { %2183 = vmatprep.subr.bf16.mxu1 %v2182_v46  ;;  %v2292_v47 = vpop.eup %2291  ;;  %v529_v10 = vadd.f32 %v525_v7, %v499_v52  ;;  %v531_v11 = vadd.f32 %v527_v8, %v501_v6 }
  0xab   : > { %2185 = vmatpush1.bf16.msra.mxu1 %v2184_v45  ;;  %v2294_v49 = vpop.eup %2293 }
  0xac   : > { %v2180_v12 = vpack.c.bf16 %v531_v11, %v529_v10 }
  0xae   : > { %v2296_v50 = vpop.eup %2295  ;;  %2181 = vmatpush1.bf16.msra.mxu0 %v2180_v12 }
  0xaf   : > { %v2298_v53 = vpop.eup %2297  ;;  %v2188_v54 = vpack.c.bf16 %v2296_v50, %v2292_v47 }
  0xb0   : > { %v2186_v55 = vpack.c.bf16 %v2298_v53, %v2294_v49 }
  0xb1   : > { %2101 = vmatmul.mubr.msk.f32.vlgmr.msra.gmra.mrb[0].mxu0 %vm533_vm9, %v2481_v13 }
  0xb2   : > { %2187 = vmatprep.subr.bf16.mxu1 %v2186_v55  ;;  %610 = vmatprep.mubr.f32.mxu0 %v2309_v16 }
  0xb3   : > { %2189 = vmatpush1.bf16.msra.mxu1 %v2188_v54 }
  0xb5   : > { %2102 = vmatmul.mubr.msk.f32.gmra.mrb[2].mxu0 %vm533_vm9, %v2486_v14 }
  0xb6   : > { %2103 = vmatmul.mubr.msk.f32.vlgmr.msra.gmra.mrb[0].mxu1 %vm762_vm4, %v755_v56  ;;  %1037 = vmatprep.mubr.f32.mxu0 %v2309_v16 }
  0xb7   : > { %1260 = vmatprep.mubr.f32.mxu1 %v2309_v16 }
 0x189   : > { %v832_v18 = vpop.f32.mrb[0].mxu1 }
 0x18a   : > { %v833_v19 = vadd.f32 %v832_v18, %v760_v15  ;;  %v834_v20 = vpop.f32.mrb[1].mxu1 }
 0x18b   : > { %v835_v21 = vadd.f32 %v834_v20, %v760_v15 }
 0x18c   : > { %v849_v23 = vadd.f32 %v833_v19, %v2465_v59  ;;  %v851_v24 = vadd.f32 %v833_v19, %v378_v61 }
 0x18d   : > { %v839_v26 = vcombine.low %v833_v19, %v835_v21  ;;  %v850_v27 = vadd.f32 %v835_v21, %v2418_v22  ;;  %v852_v29 = vadd.f32 %v835_v21, %v2422_v25 }
 0x18e   : > { %v853_v32 = vfloor.f32 %v849_v23  ;;  %v855_v33 = vfloor.f32 %v851_v24 }
 0x18f   : > { %2104 = vst.sshfl [vmem:[%s360_s22] sm:$0x33 pattern:$0x76325410] %v839_v26  ;;  %v854_v34 = vfloor.f32 %v850_v27  ;;  %v856_v35 = vfloor.f32 %v852_v29 }
 0x190   : > { %v857_v36 = vsub.f32 %v849_v23, %v853_v32  ;;  %v859_v37 = vsub.f32 %v851_v24, %v855_v33  ;;  %v866_v38 = vrot.slane %v853_v32, %v2427_v28  ;;  %v887_v39 = vadd.f32 1.0, %v853_v32 }
 0x191   : > { %v922_v40 = vrot.slane %v855_v33, %v2443_v48  ;;  %v858_v41 = vsub.f32 %v850_v27, %v854_v34  ;;  %v860_v42 = vsub.f32 %v852_v29, %v856_v35  ;;  %v943_v46 = vadd.f32 1.0, %v855_v33 }
 0x192   : > { %v861_v43 = vsub.f32 1.0, %v857_v36  ;;  %v904_v44 = vrot.slane %v857_v36, %v2427_v28  ;;  %v917_v45 = vsub.f32 1.0, %v859_v37  ;;  %v888_v47 = vadd.f32 1.0, %v854_v34 }
 0x193   : > { %v862_v25 = vsub.f32 1.0, %v858_v41  ;;  %v918_v49 = vsub.f32 1.0, %v860_v42  ;;  %v944_v50 = vadd.f32 1.0, %v856_v35  ;;  %v960_v54 = vrot.slane %v859_v37, %v2443_v48 }
 0x194   : > { %v934_v53 = vrot.slane %v917_v45, %v2443_v48  ;;  %v926_v55 = vrot.slane %v856_v35, %v2443_v48  ;;  %v964_v56 = vrot.slane %v860_v42, %v2443_v48  ;;  %v870_v60 = vrot.slane %v854_v34, %v2427_v28  ;;  %v1455_v42 = vld [vmem:[%s2912_s3 + $0x10] sm:$0xff]  ;;  %v1073_v45 = vld [vmem:[%s2911_s2 + $0x28] sm:$0xff] }
 0x195   : > { %v938_v57 = vrot.slane %v918_v49, %v2443_v48  ;;  %v952_v58 = vrot.slane %v944_v50, %v2443_v48  ;;  %v882_v61 = vrot.slane %v862_v25, %v2427_v28  ;;  %v896_v62 = vrot.slane %v888_v47, %v2427_v28  ;;  %v1074_v25 = vld [vmem:[%s2911_s2 + $0x30] sm:$0xff]  ;;  %v1458_v47 = vld [vmem:[%s2912_s3 + $0x28] sm:$0xff]  ;;  %v1075_v49 = vld [vmem:[%s2911_s2 + $0x38] sm:$0xff] }
 0x196   : > { %vm928_vm10 = vcmp.eq.f32.partialorder %v2430_v30, %v926_v55  ;;  %vm930_vm11 = vcmp.eq.f32.partialorder %v2432_v31, %v926_v55  ;;  %v908_v63 = vrot.slane %v858_v41, %v2427_v28  ;;  %vm872_vm14 = vcmp.eq.f32.partialorder %v2430_v30, %v870_v60  ;;  %v1071_v41 = vld [vmem:[%s2911_s2 + $0x18] sm:$0xff]  ;;  %v1459_v50 = vld [vmem:[%s2912_s3 + $0x30] sm:$0xff]  ;;  %v1077_v55 = vld [vmem:[%s2911_s2 + $0x48] sm:$0xff] }
 0x197   : > { %v940_v0 = vsel %vm928_vm10, %v938_v57, 0.0  ;;  %v942_v1 = vsel %vm930_vm11, %v938_v57, 0.0  ;;  %vm954_vm12 = vcmp.eq.f32.partialorder %v2430_v30, %v952_v58  ;;  %vm956_vm13 = vcmp.eq.f32.partialorder %v2432_v31, %v952_v58  ;;  %v1461_v58 = vld [vmem:[%s2912_s3 + $0x40] sm:$0xff] }
 0x198   : > { %v966_v2 = vsel %vm954_vm12, %v964_v56, 0.0  ;;  %v968_v3 = vsel %vm956_vm13, %v964_v56, 0.0  ;;  %vm874_vm15 = vcmp.eq.f32.partialorder %v2432_v31, %v870_v60  ;;  %v884_v17 = vsel %vm872_vm14, %v882_v61, 0.0  ;;  %v1078_v60 = vld [vmem:[%s2911_s2 + $0x50] sm:$0xff] }
 0x199   : > { %v970_v4 = vadd.f32 %v966_v2, %v940_v0  ;;  %v972_v5 = vadd.f32 %v968_v3, %v942_v1  ;;  %v886_v52 = vsel %vm874_vm15, %v882_v61, 0.0  ;;  %v878_v6 = vrot.slane %v861_v43, %v2427_v28  ;;  %v1072_v43 = vld [vmem:[%s2911_s2 + $0x20] sm:$0xff]  ;;  %v1463_v0 = vld [vmem:[%s2912_s3 + $0x50] sm:$0xff] }
 0x19a   : > { %vm898_vm0 = vcmp.eq.f32.partialorder %v2430_v30, %v896_v62  ;;  %vm900_vm1 = vcmp.eq.f32.partialorder %v2432_v31, %v896_v62  ;;  %vm927_vm2 = vcmp.eq.f32.partialorder %v2430_v30, %v922_v40  ;;  %vm929_vm3 = vcmp.eq.f32.partialorder %v2432_v31, %v922_v40  ;;  %v1070_v40 = vld [vmem:[%s2911_s2 + $0x10] sm:$0xff]  ;;  %v1080_v2 = vld [vmem:[%s2911_s2 + $0x60] sm:$0xff] }
 0x19b   : > { %v2190_v7 = vpack.c.bf16 %v972_v5, %v970_v4  ;;  %v910_v8 = vsel %vm898_vm0, %v908_v63, 0.0  ;;  %v912_v10 = vsel %vm900_vm1, %v908_v63, 0.0  ;;  %v939_v15 = vsel %vm927_vm2, %v934_v53, 0.0 }
 0x19c   : > { %v2522_v11 = vadd.f32 %v910_v8, %v884_v17  ;;  %v2524_v12 = vadd.f32 %v912_v10, %v886_v52  ;;  %v948_v18 = vrot.slane %v943_v46, %v2443_v48  ;;  %v941_v19 = vsel %vm929_vm3, %v934_v53, 0.0  ;;  %v1457_v46 = vld [vmem:[%s2912_s3 + $0x20] sm:$0xff]  ;;  %v1464_v52 = vld [vmem:[%s2912_s3 + $0x58] sm:$0xff]  ;;  %v1081_v8 = vld [vmem:[%s2911_s2 + $0x68] sm:$0xff] }
 0x19d   : > { %2191 = vmatprep.subr.bf16.mxu0 %v2190_v7  ;;  %vm871_vm4 = vcmp.eq.f32.partialorder %v2430_v30, %v866_v38  ;;  %vm873_vm5 = vcmp.eq.f32.partialorder %v2432_v31, %v866_v38  ;;  %v892_v20 = vrot.slane %v887_v39, %v2427_v28  ;;  %v1068_v38 = vld [vmem:[%s2911_s2] sm:$0xff]  ;;  %v1069_v39 = vld [vmem:[%s2911_s2 + $0x8] sm:$0xff]  ;;  %v399_v56 = vadd.f32 %v2447_v51, %v2465_v59 }
 0x19e   : > { %v2194_v21 = vpack.c.bf16 %v2524_v12, %v2522_v11  ;;  %vm953_vm6 = vcmp.eq.f32.partialorder %v2430_v30, %v948_v18  ;;  %vm955_vm7 = vcmp.eq.f32.partialorder %v2432_v31, %v948_v18  ;;  %v883_v23 = vsel %vm871_vm4, %v878_v6, 0.0  ;;  %v1076_v53 = vld [vmem:[%s2911_s2 + $0x40] sm:$0xff] }
 0x19f   : > { %v965_v24 = vsel %vm953_vm6, %v960_v54, 0.0  ;;  %v967_v26 = vsel %vm955_vm7, %v960_v54, 0.0  ;;  %v885_v27 = vsel %vm873_vm5, %v878_v6, 0.0  ;;  %vm897_vm8 = vcmp.eq.f32.partialorder %v2430_v30, %v892_v20  ;;  %v1460_v54 = vld [vmem:[%s2912_s3 + $0x38] sm:$0xff] }
 0x1a0   : > { %2195 = vmatprep.subr.bf16.mxu1 %v2194_v21  ;;  %v969_v48 = vadd.f32 %v965_v24, %v939_v15  ;;  %v971_v29 = vadd.f32 %v967_v26, %v941_v19  ;;  %vm899_vm10 = vcmp.eq.f32.partialorder %v2432_v31, %v892_v20  ;;  %v909_v32 = vsel %vm897_vm8, %v904_v44, 0.0  ;;  %v1465_v20 = vld [vmem:[%s2912_s3 + $0x60] sm:$0xff]  ;;  %v1466_v26 = vld [vmem:[%s2912_s3 + $0x68] sm:$0xff] }
 0x1a1   : > { %v911_v33 = vsel %vm899_vm10, %v904_v44, 0.0  ;;  %v2536_v34 = vadd.f32 %v909_v32, %v883_v23  ;;  %v1456_v44 = vld [vmem:[%s2912_s3 + $0x18] sm:$0xff]  ;;  %v400_v57 = vadd.f32 %v2392_v9, %v2418_v22  ;;  %v413_v51 = vfloor.f32 %v399_v56  ;;  %v1462_v9 = vld [vmem:[%s2912_s3 + $0x48] sm:$0xff] }
 0x1a2   : > { %v2192_v35 = vpack.c.bf16 %v971_v29, %v969_v48  ;;  %v2538_v36 = vadd.f32 %v911_v33, %v885_v27  ;;  %v1079_v22 = vld [vmem:[%s2911_s2 + $0x58] sm:$0xff] }
 0x1a3   : > { %v414_v59 = vfloor.f32 %v400_v57  ;;  %v417_v61 = vsub.f32 %v399_v56, %v413_v51  ;;  %v447_v62 = vadd.f32 1.0, %v413_v51  ;;  %v426_v4 = vrot.slane %v413_v51, %v2427_v28  ;;  %v1087_v56 = vld [vmem:[%s2911_s2 + $0x98] sm:$0xff]  ;;  %v1089_v51 = vld [vmem:[%s2911_s2 + $0xa8] sm:$0xff] }
 0x1a4   : > { %2193 = vmatpush1.bf16.msra.mxu0 %v2192_v35  ;;  %v2196_v37 = vpack.c.bf16 %v2538_v36, %v2536_v34 }
 0x1a5   : > { %2199 = vmatprep.subr.bf16.mxu0 %v2190_v7  ;;  %v418_v63 = vsub.f32 %v400_v57, %v414_v59  ;;  %v448_v1 = vadd.f32 1.0, %v414_v59  ;;  %v421_v3 = vsub.f32 1.0, %v417_v61  ;;  %v452_v5 = vrot.slane %v447_v62, %v2427_v28  ;;  %v1471_v57 = vld [vmem:[%s2912_s3 + $0x90] sm:$0xff] }
 0x1a6   : > { %2197 = vmatpush1.bf16.msra.mxu1 %v2196_v37  ;;  %v430_v6 = vrot.slane %v414_v59, %v2427_v28  ;;  %v464_v15 = vrot.slane %v417_v61, %v2427_v28  ;;  %vm431_vm11 = vcmp.eq.f32.partialorder %v2430_v30, %v426_v4  ;;  %vm433_vm15 = vcmp.eq.f32.partialorder %v2432_v31, %v426_v4  ;;  %v1473_v59 = vld [vmem:[%s2912_s3 + $0xa0] sm:$0xff]  ;;  %v1091_v61 = vld [vmem:[%s2911_s2 + $0xb8] sm:$0xff]  ;;  %v1475_v62 = vld [vmem:[%s2912_s3 + $0xb0] sm:$0xff] }
 0x1a7   : > { %2105 = vmatmul.mubr.msk.f32.vlgmr.msra.gmra.mrb[4].mxu0 %vm533_vm9, %v2481_v13  ;;  %v1453_v13 = vld [vmem:[%s2912_s3] sm:$0xff]  ;;  %v422_v17 = vsub.f32 1.0, %v418_v63  ;;  %v456_v7 = vrot.slane %v448_v1, %v2427_v28  ;;  %v438_v10 = vrot.slane %v421_v3, %v2427_v28  ;;  %vm457_vm12 = vcmp.eq.f32.partialorder %v2430_v30, %v452_v5  ;;  %v1093_v1 = vld [vmem:[%s2911_s2 + $0xc8] sm:$0xff]  ;;  %v1094_v3 = vld [vmem:[%s2911_s2 + $0xd0] sm:$0xff] }
 0x1a8   : > { %2201 = vmatpush1.bf16.msra.mxu0 %v2192_v35  ;;  %1043 = vmatprep.mubr.f32.mxu0 %v2309_v16  ;;  %v468_v19 = vrot.slane %v418_v63, %v2427_v28  ;;  %vm432_vm13 = vcmp.eq.f32.partialorder %v2430_v30, %v430_v6  ;;  %vm459_vm0 = vcmp.eq.f32.partialorder %v2432_v31, %v452_v5  ;;  %v469_v23 = vsel %vm457_vm12, %v464_v15, 0.0  ;;  %v606_v35 = vpop.f32.mrb[0].mxu0  ;;  %v1092_v63 = vld [vmem:[%s2911_s2 + $0xc0] sm:$0xff]  ;;  %v1478_v5 = vld [vmem:[%s2912_s3 + $0xc8] sm:$0xff] }
 0x1a9   : > { %2107 = vmatmul.mubr.msk.f32.vlgmr.msra.gmra.mrb[2].mxu1 %vm533_vm9, %v1068_v38  ;;  %v442_v18 = vrot.slane %v422_v17, %v2427_v28  ;;  %vm458_vm14 = vcmp.eq.f32.partialorder %v2430_v30, %v456_v7  ;;  %v1082_v28 = vld [vmem:[%s2911_s2 + $0x70] sm:$0xff]  ;;  %v443_v21 = vsel %vm431_vm11, %v438_v10, 0.0  ;;  %vm434_vm1 = vcmp.eq.f32.partialorder %v2432_v31, %v430_v6  ;;  %v608_v38 = vpop.f32.mrb[1].mxu0  ;;  %v1095_v17 = vld [vmem:[%s2911_s2 + $0xd8] sm:$0xff] }
 0x1aa   : > { %1266 = vmatprep.mubr.f32.mxu1 %v2309_v16  ;;  %vm460_vm2 = vcmp.eq.f32.partialorder %v2432_v31, %v456_v7  ;;  %v470_v24 = vsel %vm458_vm14, %v468_v19, 0.0  ;;  %v445_v27 = vsel %vm433_vm15, %v438_v10, 0.0  ;;  %v471_v48 = vsel %vm459_vm0, %v464_v15, 0.0  ;;  %v1083_v31 = vld [vmem:[%s2911_s2 + $0x78] sm:$0xff]  ;;  %v1479_v6 = vld [vmem:[%s2912_s3 + $0xd0] sm:$0xff]  ;;  %v1096_v7 = vld [vmem:[%s2911_s2 + $0xe0] sm:$0xff] }
 0x1ab   : > { %2106 = vmatmul.mubr.msk.f32.gmra.mrb[6].mxu0 %vm533_vm9, %v2486_v14  ;;  %v1454_v14 = vld [vmem:[%s2912_s3 + $0x8] sm:$0xff]  ;;  %v444_v30 = vsel %vm432_vm13, %v442_v18, 0.0  ;;  %v473_v29 = vadd.f32 %v469_v23, %v443_v21  ;;  %v446_v32 = vsel %vm434_vm1, %v442_v18, 0.0  ;;  %v472_v33 = vsel %vm460_vm2, %v468_v19, 0.0  ;;  %v1480_v10 = vld [vmem:[%s2912_s3 + $0xd8] sm:$0xff]  ;;  %v1481_v19 = vld [vmem:[%s2912_s3 + $0xe0] sm:$0xff] }
 0x1ac   : > { %1645 = vmatprep.mubr.f32.mxu0 %v2309_v16  ;;  %v474_v37 = vadd.f32 %v470_v24, %v444_v30  ;;  %v1097_v15 = vld [vmem:[%s2911_s2 + $0xe8] sm:$0xff]  ;;  %v1099_v23 = vld [vmem:[%s2911_s2 + $0xf8] sm:$0xff]  ;;  %v1483_v24 = vld [vmem:[%s2912_s3 + $0xf0] sm:$0xff] }
 0x1ad   : > { %2108 = vmatmul.mubr.msk.f32.gmra.mrb[4].mxu1 %vm533_vm9, %v1069_v39  ;;  %v475_v39 = vadd.f32 %v471_v48, %v445_v27  ;;  %v1482_v21 = vld [vmem:[%s2912_s3 + $0xe8] sm:$0xff] }
 0x1ae   : > { %1272 = vmatprep.mubr.f32.mxu1 %v2309_v16 }
 0x1af   : > { %2139 = vmatmul.mubr.msk.f32.vlgmr.msra.gmra.mrb[8].mxu0 %vm533_vm9, %v1453_v13  ;;  %v1467_v13 = vld [vmem:[%s2912_s3 + $0x70] sm:$0xff] }
 0x1b0   : > { %1651 = vmatprep.mubr.f32.mxu0 %v2309_v16 }
 0x1b1   : > { %2109 = vmatmul.mubr.msk.f32.gmra.mrb[6].mxu1 %vm533_vm9, %v1070_v40  ;;  %v476_v40 = vadd.f32 %v472_v33, %v446_v32 }
 0x1b2   : > { %1278 = vmatprep.mubr.f32.mxu1 %v2309_v16 }
 0x1b3   : > { %2140 = vmatmul.mubr.msk.f32.gmra.mrb[10].mxu0 %vm533_vm9, %v1454_v14  ;;  %v617_v14 = vmul.f32 %v606_v35, %v473_v29 }
 0x1b4   : > { %1657 = vmatprep.mubr.f32.mxu0 %v2309_v16 }
 0x1b5   : > { %2110 = vmatmul.mubr.msk.f32.gmra.mrb[8].mxu1 %vm533_vm9, %v1071_v41  ;;  %v1084_v41 = vld [vmem:[%s2911_s2 + $0x80] sm:$0xff] }
 0x1b6   : > { %1284 = vmatprep.mubr.f32.mxu1 %v2309_v16 }
 0x1b7   : > { %2141 = vmatmul.mubr.msk.f32.gmra.mrb[12].mxu0 %vm533_vm9, %v1455_v42  ;;  %v618_v42 = vmul.f32 %v608_v38, %v474_v37 }
 0x1b8   : > { %1663 = vmatprep.mubr.f32.mxu0 %v2309_v16 }
 0x1b9   : > { %2111 = vmatmul.mubr.msk.f32.gmra.mrb[10].mxu1 %vm533_vm9, %v1072_v43  ;;  %v612_v43 = vpop.f32.mrb[2].mxu0 }
 0x1ba   : > { %1290 = vmatprep.mubr.f32.mxu1 %v2309_v16 }
 0x1bb   : > { %2142 = vmatmul.mubr.msk.f32.gmra.mrb[14].mxu0 %vm533_vm9, %v1456_v44  ;;  %v619_v44 = vmul.f32 %v612_v43, %v475_v39 }
 0x1bc   : > { %1669 = vmatprep.mubr.f32.mxu0 %v2309_v16 }
 0x1bd   : > { %2112 = vmatmul.mubr.msk.f32.gmra.mrb[12].mxu1 %vm533_vm9, %v1073_v45  ;;  %v614_v45 = vpop.f32.mrb[3].mxu0 }
 0x1be   : > { %1296 = vmatprep.mubr.f32.mxu1 %v2309_v16 }
 0x1bf   : > { %2143 = vmatmul.mubr.msk.f32.gmra.mrb[16].mxu0 %vm533_vm9, %v1457_v46  ;;  %v1468_v46 = vld [vmem:[%s2912_s3 + $0x78] sm:$0xff] }
 0x1c0   : > { %1675 = vmatprep.mubr.f32.mxu0 %v2309_v16 }
 0x1c1   : > { %2113 = vmatmul.mubr.msk.f32.gmra.mrb[14].mxu1 %vm533_vm9, %v1074_v25  ;;  %v620_v25 = vmul.f32 %v614_v45, %v476_v40 }
 0x1c2   : > { %1302 = vmatprep.mubr.f32.mxu1 %v2309_v16 }
 0x1c3   : > { %2144 = vmatmul.mubr.msk.f32.gmra.mrb[18].mxu0 %vm533_vm9, %v1458_v47  ;;  %v2730_v47 = vadd.f32 %v619_v44, %v617_v14 }
 0x1c4   : > { %1681 = vmatprep.mubr.f32.mxu0 %v2309_v16 }
 0x1c5   : > { %2114 = vmatmul.mubr.msk.f32.gmra.mrb[16].mxu1 %vm533_vm9, %v1075_v49  ;;  %v1085_v49 = vld [vmem:[%s2911_s2 + $0x88] sm:$0xff] }
 0x1c6   : > { %1308 = vmatprep.mubr.f32.mxu1 %v2309_v16 }
 0x1c7   : > { %2145 = vmatmul.mubr.msk.f32.gmra.mrb[20].mxu0 %vm533_vm9, %v1459_v50  ;;  %v628_v50 = vadd.f32 %v620_v25, %v618_v42 }
 0x1c8   : > { %1687 = vmatprep.mubr.f32.mxu0 %v2309_v16 }
 0x1c9   : > { %2115 = vmatmul.mubr.msk.f32.gmra.mrb[18].mxu1 %vm533_vm9, %v1076_v53  ;;  %v1469_v53 = vld [vmem:[%s2912_s3 + $0x80] sm:$0xff]  ;;  %v629_v4 = vrot.slane %v628_v50, 4 }
 0x1ca   : > { %1314 = vmatprep.mubr.f32.mxu1 %v2309_v16 }
 0x1cb   : > { %2146 = vmatmul.mubr.msk.f32.gmra.mrb[22].mxu0 %vm533_vm9, %v1460_v54  ;;  %v1086_v54 = vld [vmem:[%s2911_s2 + $0x90] sm:$0xff] }
 0x1cc   : > { %1693 = vmatprep.mubr.f32.mxu0 %v2309_v16 }
 0x1cd   : > { %2116 = vmatmul.mubr.msk.f32.gmra.mrb[20].mxu1 %vm533_vm9, %v1077_v55  ;;  %v1470_v55 = vld [vmem:[%s2912_s3 + $0x88] sm:$0xff] }
 0x1ce   : > { %1320 = vmatprep.mubr.f32.mxu1 %v2309_v16 }
 0x1cf   : > { %2147 = vmatmul.mubr.msk.f32.gmra.mrb[24].mxu0 %vm533_vm9, %v1461_v58  ;;  %v1088_v58 = vld [vmem:[%s2911_s2 + $0xa0] sm:$0xff] }
 0x1d0   : > { %1699 = vmatprep.mubr.f32.mxu0 %v2309_v16 }
 0x1d1   : > { %2117 = vmatmul.mubr.msk.f32.gmra.mrb[22].mxu1 %vm533_vm9, %v1078_v60  ;;  %v1472_v60 = vld [vmem:[%s2912_s3 + $0x98] sm:$0xff] }
 0x1d2   : > { %1326 = vmatprep.mubr.f32.mxu1 %v2309_v16 }
 0x1d3   : > { %2148 = vmatmul.mubr.msk.f32.gmra.mrb[26].mxu0 %vm533_vm9, %v1462_v9  ;;  %v1090_v9 = vld [vmem:[%s2911_s2 + $0xb0] sm:$0xff] }
 0x1d4   : > { %1705 = vmatprep.mubr.f32.mxu0 %v2309_v16 }
 0x1d5   : > { %2118 = vmatmul.mubr.msk.f32.gmra.mrb[24].mxu1 %vm533_vm9, %v1079_v22  ;;  %v1474_v22 = vld [vmem:[%s2912_s3 + $0xa8] sm:$0xff] }
 0x1d6   : > { %1332 = vmatprep.mubr.f32.mxu1 %v2309_v16 }
 0x1d7   : > { %2149 = vmatmul.mubr.msk.f32.gmra.mrb[28].mxu0 %vm533_vm9, %v1463_v0  ;;  %v1476_v0 = vld [vmem:[%s2912_s3 + $0xb8] sm:$0xff] }
 0x1d8   : > { %1711 = vmatprep.mubr.f32.mxu0 %v2309_v16 }
 0x1d9   : > { %2119 = vmatmul.mubr.msk.f32.gmra.mrb[26].mxu1 %vm533_vm9, %v1080_v2  ;;  %v1477_v2 = vld [vmem:[%s2912_s3 + $0xc0] sm:$0xff] }
 0x1da   : > { %1338 = vmatprep.mubr.f32.mxu1 %v2309_v16 }
 0x1db   : > { %2150 = vmatmul.mubr.msk.f32.gmra.mrb[30].mxu0 %vm533_vm9, %v1464_v52  ;;  %v630_v52 = vadd.f32 %v629_v4, %v628_v50 }
 0x1dc   : > { %1717 = vmatprep.mubr.f32.mxu0 %v2309_v16 }
 0x1dd   : > { %2120 = vmatmul.mubr.msk.f32.gmra.mrb[28].mxu1 %vm533_vm9, %v1081_v8  ;;  %v631_v8 = vrot.slane %v630_v52, 2 }
 0x1de   : > { %1344 = vmatprep.mubr.f32.mxu1 %v2309_v16 }
 0x1df   : > { %2151 = vmatmul.mubr.msk.f32.gmra.mrb[32].mxu0 %vm533_vm9, %v1465_v20  ;;  %v632_v18 = vadd.f32 %v631_v8, %v630_v52  ;;  %v1098_v20 = vld [vmem:[%s2911_s2 + $0xf0] sm:$0xff] }
 0x1e0   : > { %1723 = vmatprep.mubr.f32.mxu0 %v2309_v16 }
 0x1e1   : > { %2121 = vmatmul.mubr.msk.f32.gmra.mrb[30].mxu1 %vm533_vm9, %v1082_v28  ;;  %v633_v28 = vrot.slane %v632_v18, 1 }
 0x1e2   : > { %1350 = vmatprep.mubr.f32.mxu1 %v2309_v16 }
 0x1e3   : > { %2152 = vmatmul.mubr.msk.f32.gmra.mrb[34].mxu0 %vm533_vm9, %v1466_v26  ;;  %v634_v30 = vadd.f32 %v633_v28, %v632_v18  ;;  %v1484_v26 = vld [vmem:[%s2912_s3 + $0xf8] sm:$0xff] }
 0x1e4   : > { %1729 = vmatprep.mubr.f32.mxu0 %v2309_v16 }
 0x1e5   : > { %2122 = vmatmul.mubr.msk.f32.gmra.mrb[32].mxu1 %vm533_vm9, %v1083_v31 }
 0x1e6   : > { %1356 = vmatprep.mubr.f32.mxu1 %v2309_v16 }
 0x1e7   : > { %2153 = vmatmul.mubr.msk.f32.gmra.mrb[36].mxu0 %vm533_vm9, %v1467_v13 }
 0x1e8   : > { %1735 = vmatprep.mubr.f32.mxu0 %v2309_v16 }
 0x1e9   : > { %2123 = vmatmul.mubr.msk.f32.gmra.mrb[34].mxu1 %vm533_vm9, %v1084_v41 }
 0x1ea   : > { %1362 = vmatprep.mubr.f32.mxu1 %v2309_v16 }
 0x1eb   : > { %2154 = vmatmul.mubr.msk.f32.gmra.mrb[38].mxu0 %vm533_vm9, %v1468_v46 }
 0x1ec   : > { %1741 = vmatprep.mubr.f32.mxu0 %v2309_v16 }
 0x1ed   : > { %2124 = vmatmul.mubr.msk.f32.gmra.mrb[36].mxu1 %vm533_vm9, %v1085_v49 }
 0x1ee   : > { %1368 = vmatprep.mubr.f32.mxu1 %v2309_v16 }
 0x1ef   : > { %2155 = vmatmul.mubr.msk.f32.gmra.mrb[40].mxu0 %vm533_vm9, %v1469_v53 }
 0x1f0   : > { %1747 = vmatprep.mubr.f32.mxu0 %v2309_v16 }
 0x1f1   : > { %2125 = vmatmul.mubr.msk.f32.gmra.mrb[38].mxu1 %vm533_vm9, %v1086_v54 }
 0x1f2   : > { %1374 = vmatprep.mubr.f32.mxu1 %v2309_v16 }
 0x1f3   : > { %2156 = vmatmul.mubr.msk.f32.gmra.mrb[42].mxu0 %vm533_vm9, %v1470_v55 }
 0x1f4   : > { %1753 = vmatprep.mubr.f32.mxu0 %v2309_v16 }
 0x1f5   : > { %2126 = vmatmul.mubr.msk.f32.gmra.mrb[40].mxu1 %vm533_vm9, %v1087_v56 }
 0x1f6   : > { %1380 = vmatprep.mubr.f32.mxu1 %v2309_v16 }
 0x1f7   : > { %2157 = vmatmul.mubr.msk.f32.gmra.mrb[44].mxu0 %vm533_vm9, %v1471_v57 }
 0x1f8   : > { %1759 = vmatprep.mubr.f32.mxu0 %v2309_v16 }
 0x1f9   : > { %2127 = vmatmul.mubr.msk.f32.gmra.mrb[42].mxu1 %vm533_vm9, %v1088_v58 }
 0x1fa   : > { %1386 = vmatprep.mubr.f32.mxu1 %v2309_v16 }
 0x1fb   : > { %2158 = vmatmul.mubr.msk.f32.gmra.mrb[46].mxu0 %vm533_vm9, %v1472_v60 }
 0x1fc   : > { %1765 = vmatprep.mubr.f32.mxu0 %v2309_v16 }
 0x1fd   : > { %2128 = vmatmul.mubr.msk.f32.gmra.mrb[44].mxu1 %vm533_vm9, %v1089_v51 }
 0x1fe   : > { %1392 = vmatprep.mubr.f32.mxu1 %v2309_v16 }
 0x1ff   : > { %2159 = vmatmul.mubr.msk.f32.gmra.mrb[48].mxu0 %vm533_vm9, %v1473_v59 }
 0x200   : > { %1771 = vmatprep.mubr.f32.mxu0 %v2309_v16 }
 0x201   : > { %2129 = vmatmul.mubr.msk.f32.gmra.mrb[46].mxu1 %vm533_vm9, %v1090_v9 }
 0x202   : > { %1398 = vmatprep.mubr.f32.mxu1 %v2309_v16 }
 0x203   : > { %2160 = vmatmul.mubr.msk.f32.gmra.mrb[50].mxu0 %vm533_vm9, %v1474_v22 }
 0x204   : > { %1777 = vmatprep.mubr.f32.mxu0 %v2309_v16 }
 0x205   : > { %2130 = vmatmul.mubr.msk.f32.gmra.mrb[48].mxu1 %vm533_vm9, %v1091_v61 }
 0x206   : > { %1404 = vmatprep.mubr.f32.mxu1 %v2309_v16 }
 0x207   : > { %2161 = vmatmul.mubr.msk.f32.gmra.mrb[52].mxu0 %vm533_vm9, %v1475_v62 }
 0x208   : > { %1783 = vmatprep.mubr.f32.mxu0 %v2309_v16 }
 0x209   : > { %2131 = vmatmul.mubr.msk.f32.gmra.mrb[50].mxu1 %vm533_vm9, %v1092_v63 }
 0x20a   : > { %1410 = vmatprep.mubr.f32.mxu1 %v2309_v16 }
 0x20b   : > { %2162 = vmatmul.mubr.msk.f32.gmra.mrb[54].mxu0 %vm533_vm9, %v1476_v0 }
 0x20c   : > { %1789 = vmatprep.mubr.f32.mxu0 %v2309_v16 }
 0x20d   : > { %2132 = vmatmul.mubr.msk.f32.gmra.mrb[52].mxu1 %vm533_vm9, %v1093_v1 }
 0x20e   : > { %1416 = vmatprep.mubr.f32.mxu1 %v2309_v16 }
 0x20f   : > { %2163 = vmatmul.mubr.msk.f32.gmra.mrb[56].mxu0 %vm533_vm9, %v1477_v2 }
 0x210   : > { %1795 = vmatprep.mubr.f32.mxu0 %v2309_v16 }
 0x211   : > { %2133 = vmatmul.mubr.msk.f32.gmra.mrb[54].mxu1 %vm533_vm9, %v1094_v3 }
 0x212   : > { %1422 = vmatprep.mubr.f32.mxu1 %v2309_v16 }
 0x213   : > { %2164 = vmatmul.mubr.msk.f32.gmra.mrb[58].mxu0 %vm533_vm9, %v1478_v5 }
 0x214   : > { %1801 = vmatprep.mubr.f32.mxu0 %v2309_v16 }
 0x215   : > { %2134 = vmatmul.mubr.msk.f32.gmra.mrb[56].mxu1 %vm533_vm9, %v1095_v17 }
 0x216   : > { %1428 = vmatprep.mubr.f32.mxu1 %v2309_v16 }
 0x217   : > { %2165 = vmatmul.mubr.msk.f32.gmra.mrb[60].mxu0 %vm533_vm9, %v1479_v6 }
 0x218   : > { %1807 = vmatprep.mubr.f32.mxu0 %v2309_v16 }
 0x219   : > { %2135 = vmatmul.mubr.msk.f32.gmra.mrb[58].mxu1 %vm533_vm9, %v1096_v7 }
 0x21a   : > { %1434 = vmatprep.mubr.f32.mxu1 %v2309_v16 }
 0x21b   : > { %2166 = vmatmul.mubr.msk.f32.gmra.mrb[62].mxu0 %vm533_vm9, %v1480_v10 }
 0x21c   : > { %1813 = vmatprep.mubr.f32.mxu0 %v2309_v16 }
 0x21d   : > { %2136 = vmatmul.mubr.msk.f32.gmra.mrb[60].mxu1 %vm533_vm9, %v1097_v15 }
 0x21e   : > { %1440 = vmatprep.mubr.f32.mxu1 %v2309_v16 }
 0x21f   : > { %2167 = vmatmul.mubr.msk.f32.gmra.mrb[64].mxu0 %vm533_vm9, %v1481_v19 }
 0x220   : > { %1819 = vmatprep.mubr.f32.mxu0 %v2309_v16 }
 0x221   : > { %2137 = vmatmul.mubr.msk.f32.gmra.mrb[62].mxu1 %vm533_vm9, %v1098_v20 }
 0x222   : > { %1446 = vmatprep.mubr.f32.mxu1 %v2309_v16 }
 0x223   : > { %2168 = vmatmul.mubr.msk.f32.gmra.mrb[66].mxu0 %vm533_vm9, %v1482_v21 }
 0x224   : > { %1825 = vmatprep.mubr.f32.mxu0 %v2309_v16 }
 0x225   : > { %2138 = vmatmul.mubr.msk.f32.gmra.mrb[64].mxu1 %vm533_vm9, %v1099_v23 }
 0x226   : > { %1966 = vmatprep.mubr.f32.mxu1 %v634_v30 }
 0x227   : > { %2169 = vmatmul.mubr.msk.f32.gmra.mrb[68].mxu0 %vm533_vm9, %v1483_v24 }
 0x228   : > { %1831 = vmatprep.mubr.f32.mxu0 %v2309_v16 }
 0x22b   : > { %2170 = vmatmul.mubr.msk.f32.gmra.mrb[70].mxu0 %vm533_vm9, %v1484_v26  ;;  %vm1973_vm9 = vcmask 1040384  }
 0x27a   : > { %v1039_v27 = vpop.f32.mrb[4].mxu0 }
 0x27b   : > { %v1041_v48 = vpop.f32.mrb[5].mxu0  ;;  %v1050_v31 = vmul.f32 %v1039_v27, %v2536_v34 }
 0x27c   : > { %v1262_v29 = vpop.f32.mrb[2].mxu1  ;;  %v1051_v38 = vmul.f32 %v1041_v48, %v2522_v11 }
 0x27d   : > { %v1264_v32 = vpop.f32.mrb[3].mxu1 }
 0x27e   : > { %v1045_v33 = vpop.f32.mrb[6].mxu0 }
 0x27f   : > { %v1052_v35 = vmul.f32 %v1045_v33, %v2538_v36  ;;  %v1047_v37 = vpop.f32.mrb[7].mxu0 }
 0x280   : > { %v1053_v16 = vmul.f32 %v1047_v37, %v2524_v12  ;;  %v1268_v39 = vpop.f32.mrb[4].mxu1 }
 0x281   : > { %v2892_v13 = vadd.f32 %v1052_v35, %v1050_v31  ;;  %v1270_v40 = vpop.f32.mrb[5].mxu1 }
 0x282   : > { %v2894_v14 = vadd.f32 %v1053_v16, %v1051_v38  ;;  %v1647_v41 = vpop.f32.mrb[8].mxu0 }
 0x283   : > { %v1838_v42 = vmul.f32 %v1647_v41, %v1262_v29  ;;  %v1649_v43 = vpop.f32.mrb[9].mxu0 }
 0x284   : > { %v1839_v44 = vmul.f32 %v1649_v43, %v1264_v32  ;;  %v1274_v45 = vpop.f32.mrb[6].mxu1 }
 0x285   : > { %v1276_v46 = vpop.f32.mrb[7].mxu1 }
 0x286   : > { %v1653_v34 = vpop.f32.mrb[10].mxu0 }
 0x287   : > { %v1840_v25 = vmul.f32 %v1653_v34, %v1268_v39  ;;  %v1655_v36 = vpop.f32.mrb[11].mxu0 }
 0x288   : > { %v1841_v49 = vmul.f32 %v1655_v36, %v1270_v40  ;;  %v1280_v50 = vpop.f32.mrb[8].mxu1 }
 0x289   : > { %v2204_v11 = vpack.c.bf16 %v1840_v25, %v1838_v42  ;;  %v1282_v53 = vpop.f32.mrb[9].mxu1 }
 0x28a   : > { %v2202_v12 = vpack.c.bf16 %v1841_v49, %v1839_v44  ;;  %v1659_v54 = vpop.f32.mrb[12].mxu0 }
 0x28b   : > { %v1842_v55 = vmul.f32 %v1659_v54, %v1274_v45  ;;  %v1661_v56 = vpop.f32.mrb[13].mxu0 }
 0x28c   : > { %v1843_v57 = vmul.f32 %v1661_v56, %v1276_v46  ;;  %2203 = vmatprep.subr.bf16.mxu1 %v2202_v12  ;;  %v1286_v58 = vpop.f32.mrb[10].mxu1 }
 0x28d   : > { %2205 = vmatpush1.bf16.msra.mxu1 %v2204_v11  ;;  %v1288_v60 = vpop.f32.mrb[11].mxu1 }
 0x28e   : > { %v1665_v51 = vpop.f32.mrb[14].mxu0 }
 0x28f   : > { %v1844_v59 = vmul.f32 %v1665_v51, %v1280_v50  ;;  %v1667_v9 = vpop.f32.mrb[15].mxu0 }
 0x290   : > { %v1845_v22 = vmul.f32 %v1667_v9, %v1282_v53  ;;  %v1292_v61 = vpop.f32.mrb[12].mxu1 }
 0x291   : > { %v2208_v62 = vpack.c.bf16 %v1844_v59, %v1842_v55  ;;  %v1294_v63 = vpop.f32.mrb[13].mxu1 }
 0x292   : > { %v2206_v0 = vpack.c.bf16 %v1845_v22, %v1843_v57  ;;  %v1671_v1 = vpop.f32.mrb[16].mxu0 }
 0x293   : > { %v1846_v2 = vmul.f32 %v1671_v1, %v1286_v58  ;;  %v1673_v3 = vpop.f32.mrb[17].mxu0 }
 0x294   : > { %v1847_v4 = vmul.f32 %v1673_v3, %v1288_v60  ;;  %2207 = vmatprep.subr.bf16.mxu1 %v2206_v0  ;;  %v1298_v5 = vpop.f32.mrb[14].mxu1 }
 0x295   : > { %2209 = vmatpush1.bf16.msra.mxu1 %v2208_v62  ;;  %v1300_v17 = vpop.f32.mrb[15].mxu1 }
 0x296   : > { %v1677_v52 = vpop.f32.mrb[18].mxu0 }
 0x297   : > { %v1848_v6 = vmul.f32 %v1677_v52, %v1292_v61  ;;  %v1679_v7 = vpop.f32.mrb[19].mxu0 }
 0x298   : > { %v1849_v8 = vmul.f32 %v1679_v7, %v1294_v63  ;;  %v1304_v10 = vpop.f32.mrb[16].mxu1 }
 0x299   : > { %v2212_v15 = vpack.c.bf16 %v1848_v6, %v1846_v2  ;;  %v1306_v18 = vpop.f32.mrb[17].mxu1 }
 0x29a   : > { %v2210_v19 = vpack.c.bf16 %v1849_v8, %v1847_v4  ;;  %v1683_v20 = vpop.f32.mrb[20].mxu0 }
 0x29b   : > { %v1850_v28 = vmul.f32 %v1683_v20, %v1298_v5  ;;  %v1685_v21 = vpop.f32.mrb[21].mxu0 }
 0x29c   : > { %v1851_v23 = vmul.f32 %v1685_v21, %v1300_v17  ;;  %2211 = vmatprep.subr.bf16.mxu1 %v2210_v19  ;;  %v1310_v30 = vpop.f32.mrb[18].mxu1 }
 0x29d   : > { %2213 = vmatpush1.bf16.msra.mxu1 %v2212_v15  ;;  %v1312_v24 = vpop.f32.mrb[19].mxu1 }
 0x29e   : > { %v1689_v26 = vpop.f32.mrb[22].mxu0 }
 0x29f   : > { %v1852_v27 = vmul.f32 %v1689_v26, %v1304_v10  ;;  %v1691_v48 = vpop.f32.mrb[23].mxu0 }
 0x2a0   : > { %v1853_v29 = vmul.f32 %v1691_v48, %v1306_v18  ;;  %v1316_v32 = vpop.f32.mrb[20].mxu1 }
 0x2a1   : > { %v2216_v33 = vpack.c.bf16 %v1852_v27, %v1850_v28  ;;  %v1318_v31 = vpop.f32.mrb[21].mxu1 }
 0x2a2   : > { %v2214_v35 = vpack.c.bf16 %v1853_v29, %v1851_v23  ;;  %v1695_v37 = vpop.f32.mrb[24].mxu0 }
 0x2a3   : > { %v1854_v38 = vmul.f32 %v1695_v37, %v1310_v30  ;;  %v1697_v16 = vpop.f32.mrb[25].mxu0 }
 0x2a4   : > { %v1855_v39 = vmul.f32 %v1697_v16, %v1312_v24  ;;  %2215 = vmatprep.subr.bf16.mxu1 %v2214_v35  ;;  %v1322_v40 = vpop.f32.mrb[22].mxu1 }
 0x2a5   : > { %2217 = vmatpush1.bf16.msra.mxu1 %v2216_v33  ;;  %v1324_v41 = vpop.f32.mrb[23].mxu1 }
 0x2a6   : > { %v1701_v42 = vpop.f32.mrb[26].mxu0 }
 0x2a7   : > { %v1856_v43 = vmul.f32 %v1701_v42, %v1316_v32  ;;  %v1703_v44 = vpop.f32.mrb[27].mxu0 }
 0x2a8   : > { %v1857_v45 = vmul.f32 %v1703_v44, %v1318_v31  ;;  %v1328_v46 = vpop.f32.mrb[24].mxu1 }
 0x2a9   : > { %v2220_v34 = vpack.c.bf16 %v1856_v43, %v1854_v38  ;;  %v1330_v25 = vpop.f32.mrb[25].mxu1 }
 0x2aa   : > { %v2218_v36 = vpack.c.bf16 %v1857_v45, %v1855_v39  ;;  %v1707_v49 = vpop.f32.mrb[28].mxu0 }
 0x2ab   : > { %v1858_v50 = vmul.f32 %v1707_v49, %v1322_v40  ;;  %v1709_v11 = vpop.f32.mrb[29].mxu0 }
 0x2ac   : > { %v1859_v53 = vmul.f32 %v1709_v11, %v1324_v41  ;;  %2219 = vmatprep.subr.bf16.mxu1 %v2218_v36  ;;  %v1334_v12 = vpop.f32.mrb[26].mxu1 }
 0x2ad   : > { %2221 = vmatpush1.bf16.msra.mxu1 %v2220_v34  ;;  %v1336_v54 = vpop.f32.mrb[27].mxu1 }
 0x2ae   : > { %v1713_v55 = vpop.f32.mrb[30].mxu0 }
 0x2af   : > { %v1860_v56 = vmul.f32 %v1713_v55, %v1328_v46  ;;  %v1715_v57 = vpop.f32.mrb[31].mxu0 }
 0x2b0   : > { %v1861_v58 = vmul.f32 %v1715_v57, %v1330_v25  ;;  %v1340_v60 = vpop.f32.mrb[28].mxu1 }
 0x2b1   : > { %v2224_v51 = vpack.c.bf16 %v1860_v56, %v1858_v50  ;;  %v1342_v59 = vpop.f32.mrb[29].mxu1 }
 0x2b2   : > { %v2222_v9 = vpack.c.bf16 %v1861_v58, %v1859_v53  ;;  %v1719_v22 = vpop.f32.mrb[32].mxu0 }
 0x2b3   : > { %v1862_v61 = vmul.f32 %v1719_v22, %v1334_v12  ;;  %v1721_v62 = vpop.f32.mrb[33].mxu0 }
 0x2b4   : > { %v1863_v63 = vmul.f32 %v1721_v62, %v1336_v54  ;;  %2223 = vmatprep.subr.bf16.mxu1 %v2222_v9  ;;  %v1346_v0 = vpop.f32.mrb[30].mxu1 }
 0x2b5   : > { %2225 = vmatpush1.bf16.msra.mxu1 %v2224_v51  ;;  %v1348_v1 = vpop.f32.mrb[31].mxu1 }
 0x2b6   : > { %v1725_v2 = vpop.f32.mrb[34].mxu0 }
 0x2b7   : > { %v1864_v3 = vmul.f32 %v1725_v2, %v1340_v60  ;;  %v1727_v4 = vpop.f32.mrb[35].mxu0 }
 0x2b8   : > { %v1865_v5 = vmul.f32 %v1727_v4, %v1342_v59  ;;  %v1352_v17 = vpop.f32.mrb[32].mxu1 }
 0x2b9   : > { %v2228_v52 = vpack.c.bf16 %v1864_v3, %v1862_v61  ;;  %v1354_v6 = vpop.f32.mrb[33].mxu1 }
 0x2ba   : > { %v2226_v7 = vpack.c.bf16 %v1865_v5, %v1863_v63  ;;  %v1731_v8 = vpop.f32.mrb[36].mxu0 }
 0x2bb   : > { %v1866_v10 = vmul.f32 %v1731_v8, %v1346_v0  ;;  %v1733_v15 = vpop.f32.mrb[37].mxu0 }
 0x2bc   : > { %v1867_v18 = vmul.f32 %v1733_v15, %v1348_v1  ;;  %2227 = vmatprep.subr.bf16.mxu1 %v2226_v7  ;;  %v1358_v19 = vpop.f32.mrb[34].mxu1 }
 0x2bd   : > { %2229 = vmatpush1.bf16.msra.mxu1 %v2228_v52  ;;  %v1360_v20 = vpop.f32.mrb[35].mxu1 }
 0x2be   : > { %v1737_v28 = vpop.f32.mrb[38].mxu0 }
 0x2bf   : > { %v1868_v21 = vmul.f32 %v1737_v28, %v1352_v17  ;;  %v1739_v23 = vpop.f32.mrb[39].mxu0 }
 0x2c0   : > { %v1869_v30 = vmul.f32 %v1739_v23, %v1354_v6  ;;  %v1364_v24 = vpop.f32.mrb[36].mxu1 }
 0x2c1   : > { %v2232_v26 = vpack.c.bf16 %v1868_v21, %v1866_v10  ;;  %v1366_v27 = vpop.f32.mrb[37].mxu1 }
 0x2c2   : > { %v2230_v48 = vpack.c.bf16 %v1869_v30, %v1867_v18  ;;  %v1743_v29 = vpop.f32.mrb[40].mxu0 }
 0x2c3   : > { %v1870_v32 = vmul.f32 %v1743_v29, %v1358_v19  ;;  %v1745_v33 = vpop.f32.mrb[41].mxu0 }
 0x2c4   : > { %v1871_v31 = vmul.f32 %v1745_v33, %v1360_v20  ;;  %2231 = vmatprep.subr.bf16.mxu1 %v2230_v48  ;;  %v1370_v35 = vpop.f32.mrb[38].mxu1 }
 0x2c5   : > { %2233 = vmatpush1.bf16.msra.mxu1 %v2232_v26  ;;  %v1372_v37 = vpop.f32.mrb[39].mxu1 }
 0x2c6   : > { %v1749_v38 = vpop.f32.mrb[42].mxu0 }
 0x2c7   : > { %v1872_v16 = vmul.f32 %v1749_v38, %v1364_v24  ;;  %v1751_v39 = vpop.f32.mrb[43].mxu0 }
 0x2c8   : > { %v1873_v40 = vmul.f32 %v1751_v39, %v1366_v27  ;;  %v1376_v41 = vpop.f32.mrb[40].mxu1 }
 0x2c9   : > { %v2236_v42 = vpack.c.bf16 %v1872_v16, %v1870_v32  ;;  %v1378_v43 = vpop.f32.mrb[41].mxu1 }
 0x2ca   : > { %v2234_v44 = vpack.c.bf16 %v1873_v40, %v1871_v31  ;;  %v1755_v45 = vpop.f32.mrb[44].mxu0 }
 0x2cb   : > { %v1874_v46 = vmul.f32 %v1755_v45, %v1370_v35  ;;  %v1757_v34 = vpop.f32.mrb[45].mxu0 }
 0x2cc   : > { %v1875_v25 = vmul.f32 %v1757_v34, %v1372_v37  ;;  %2235 = vmatprep.subr.bf16.mxu1 %v2234_v44  ;;  %v1382_v36 = vpop.f32.mrb[42].mxu1 }
 0x2cd   : > { %2237 = vmatpush1.bf16.msra.mxu1 %v2236_v42  ;;  %v1384_v49 = vpop.f32.mrb[43].mxu1 }
 0x2ce   : > { %v1761_v50 = vpop.f32.mrb[46].mxu0 }
 0x2cf   : > { %v1876_v11 = vmul.f32 %v1761_v50, %v1376_v41  ;;  %v1763_v53 = vpop.f32.mrb[47].mxu0 }
 0x2d0   : > { %v1877_v12 = vmul.f32 %v1763_v53, %v1378_v43  ;;  %v1388_v54 = vpop.f32.mrb[44].mxu1  ;;  %v622_v53 = vrot.slane %v2730_v47, 4 }
 0x2d1   : > { %v2240_v55 = vpack.c.bf16 %v1876_v11, %v1874_v46  ;;  %v1390_v56 = vpop.f32.mrb[45].mxu1 }
 0x2d2   : > { %v2238_v57 = vpack.c.bf16 %v1877_v12, %v1875_v25  ;;  %v1767_v58 = vpop.f32.mrb[48].mxu0 }
 0x2d3   : > { %v1878_v60 = vmul.f32 %v1767_v58, %v1382_v36  ;;  %v1769_v51 = vpop.f32.mrb[49].mxu0 }
 0x2d4   : > { %v1879_v59 = vmul.f32 %v1769_v51, %v1384_v49  ;;  %2239 = vmatprep.subr.bf16.mxu1 %v2238_v57  ;;  %v1394_v9 = vpop.f32.mrb[46].mxu1  ;;  %v623_v51 = vadd.f32 %v622_v53, %v2730_v47 }
 0x2d5   : > { %2241 = vmatpush1.bf16.msra.mxu1 %v2240_v55  ;;  %v1396_v22 = vpop.f32.mrb[47].mxu1 }
 0x2d6   : > { %v1773_v61 = vpop.f32.mrb[50].mxu0 }
 0x2d7   : > { %v1880_v62 = vmul.f32 %v1773_v61, %v1388_v54  ;;  %v1775_v63 = vpop.f32.mrb[51].mxu0 }
 0x2d8   : > { %v1881_v0 = vmul.f32 %v1775_v63, %v1390_v56  ;;  %v1400_v1 = vpop.f32.mrb[48].mxu1 }
 0x2d9   : > { %v2244_v2 = vpack.c.bf16 %v1880_v62, %v1878_v60  ;;  %v1402_v3 = vpop.f32.mrb[49].mxu1 }
 0x2da   : > { %v2242_v4 = vpack.c.bf16 %v1881_v0, %v1879_v59  ;;  %v1779_v5 = vpop.f32.mrb[52].mxu0 }
 0x2db   : > { %v1882_v17 = vmul.f32 %v1779_v5, %v1394_v9  ;;  %v1781_v52 = vpop.f32.mrb[53].mxu0 }
 0x2dc   : > { %v1883_v6 = vmul.f32 %v1781_v52, %v1396_v22  ;;  %2243 = vmatprep.subr.bf16.mxu1 %v2242_v4  ;;  %v1406_v7 = vpop.f32.mrb[50].mxu1 }
 0x2dd   : > { %2245 = vmatpush1.bf16.msra.mxu1 %v2244_v2  ;;  %v1408_v8 = vpop.f32.mrb[51].mxu1 }
 0x2de   : > { %v1785_v10 = vpop.f32.mrb[54].mxu0 }
 0x2df   : > { %v1884_v15 = vmul.f32 %v1785_v10, %v1400_v1  ;;  %v1787_v18 = vpop.f32.mrb[55].mxu0  ;;  %v624_v1 = vrot.slane %v623_v51, 2 }
 0x2e0   : > { %v1885_v19 = vmul.f32 %v1787_v18, %v1402_v3  ;;  %v1412_v20 = vpop.f32.mrb[52].mxu1 }
 0x2e1   : > { %v2248_v28 = vpack.c.bf16 %v1884_v15, %v1882_v17  ;;  %v1414_v21 = vpop.f32.mrb[53].mxu1  ;;  %v625_v52 = vadd.f32 %v624_v1, %v623_v51 }
 0x2e2   : > { %v2246_v23 = vpack.c.bf16 %v1885_v19, %v1883_v6  ;;  %v1791_v30 = vpop.f32.mrb[56].mxu0 }
 0x2e3   : > { %v1886_v24 = vmul.f32 %v1791_v30, %v1406_v7  ;;  %v1793_v26 = vpop.f32.mrb[57].mxu0  ;;  %v626_v15 = vrot.slane %v625_v52, 1 }
 0x2e4   : > { %v1887_v27 = vmul.f32 %v1793_v26, %v1408_v8  ;;  %2247 = vmatprep.subr.bf16.mxu1 %v2246_v23  ;;  %v1418_v48 = vpop.f32.mrb[54].mxu1 }
 0x2e5   : > { %2249 = vmatpush1.bf16.msra.mxu1 %v2248_v28  ;;  %v1420_v29 = vpop.f32.mrb[55].mxu1  ;;  %v627_v19 = vadd.f32 %v626_v15, %v625_v52  ;;  %v1062_v28 = vrot.slane %v2894_v14, 4 }
 0x2e6   : > { %v1797_v32 = vpop.f32.mrb[58].mxu0 }
 0x2e7   : > { %v1888_v33 = vmul.f32 %v1797_v32, %v1412_v20  ;;  %v1799_v31 = vpop.f32.mrb[59].mxu0  ;;  %v1055_v20 = vrot.slane %v2892_v13, 4  ;;  %v1063_v23 = vadd.f32 %v1062_v28, %v2894_v14 }
 0x2e8   : > { %v1889_v35 = vmul.f32 %v1799_v31, %v1414_v21  ;;  %v1424_v37 = vpop.f32.mrb[56].mxu1 }
 0x2e9   : > { %v2252_v38 = vpack.c.bf16 %v1888_v33, %v1886_v24  ;;  %v1426_v16 = vpop.f32.mrb[57].mxu1  ;;  %v1056_v21 = vadd.f32 %v1055_v20, %v2892_v13  ;;  %v1064_v24 = vrot.slane %v1063_v23, 2 }
 0x2ea   : > { %v2250_v39 = vpack.c.bf16 %v1889_v35, %v1887_v27  ;;  %v1803_v40 = vpop.f32.mrb[60].mxu0 }
 0x2eb   : > { %v1890_v41 = vmul.f32 %v1803_v40, %v1418_v48  ;;  %v1805_v42 = vpop.f32.mrb[61].mxu0  ;;  %v1057_v30 = vrot.slane %v1056_v21, 2  ;;  %v1065_v27 = vadd.f32 %v1064_v24, %v1063_v23 }
 0x2ec   : > { %v1891_v43 = vmul.f32 %v1805_v42, %v1420_v29  ;;  %2251 = vmatprep.subr.bf16.mxu1 %v2250_v39  ;;  %v1430_v44 = vpop.f32.mrb[58].mxu1 }
 0x2ed   : > { %2253 = vmatpush1.bf16.msra.mxu1 %v2252_v38  ;;  %v1432_v45 = vpop.f32.mrb[59].mxu1  ;;  %v1058_v26 = vadd.f32 %v1057_v30, %v1056_v21  ;;  %v1066_v29 = vrot.slane %v1065_v27, 1 }
 0x2ee   : > { %v1809_v46 = vpop.f32.mrb[62].mxu0 }
 0x2ef   : > { %v1892_v34 = vmul.f32 %v1809_v46, %v1424_v37  ;;  %v1811_v25 = vpop.f32.mrb[63].mxu0  ;;  %v1059_v48 = vrot.slane %v1058_v26, 1  ;;  %v1067_v31 = vadd.f32 %v1066_v29, %v1065_v27 }
 0x2f0   : > { %v1893_v36 = vmul.f32 %v1811_v25, %v1426_v16  ;;  %v1436_v49 = vpop.f32.mrb[60].mxu1 }
 0x2f1   : > { %v2256_v50 = vpack.c.bf16 %v1892_v34, %v1890_v41  ;;  %v1438_v11 = vpop.f32.mrb[61].mxu1  ;;  %v1060_v32 = vadd.f32 %v1059_v48, %v1058_v26 }
 0x2f2   : > { %v2254_v12 = vpack.c.bf16 %v1893_v36, %v1891_v43  ;;  %v1815_v54 = vpop.f32.mrb[64].mxu0 }
 0x2f3   : > { %v1894_v55 = vmul.f32 %v1815_v54, %v1430_v44  ;;  %v1817_v56 = vpop.f32.mrb[65].mxu0 }
 0x2f4   : > { %v1895_v57 = vmul.f32 %v1817_v56, %v1432_v45  ;;  %2255 = vmatprep.subr.bf16.mxu1 %v2254_v12  ;;  %v1442_v58 = vpop.f32.mrb[62].mxu1 }
 0x2f5   : > { %2257 = vmatpush1.bf16.msra.mxu1 %v2256_v50  ;;  %v1444_v60 = vpop.f32.mrb[63].mxu1 }
 0x2f6   : > { %v1821_v59 = vpop.f32.mrb[66].mxu0 }
 0x2f7   : > { %v1896_v9 = vmul.f32 %v1821_v59, %v1436_v49  ;;  %v1823_v22 = vpop.f32.mrb[67].mxu0 }
 0x2f8   : > { %v1897_v61 = vmul.f32 %v1823_v22, %v1438_v11  ;;  %v1448_v62 = vpop.f32.mrb[64].mxu1 }
 0x2f9   : > { %v2260_v63 = vpack.c.bf16 %v1896_v9, %v1894_v55  ;;  %v1450_v0 = vpop.f32.mrb[65].mxu1 }
 0x2fa   : > { %v2258_v2 = vpack.c.bf16 %v1897_v61, %v1895_v57  ;;  %v1827_v3 = vpop.f32.mrb[68].mxu0 }
 0x2fb   : > { %v1898_v4 = vmul.f32 %v1827_v3, %v1442_v58  ;;  %v1829_v5 = vpop.f32.mrb[69].mxu0 }
 0x2fc   : > { %v1899_v17 = vmul.f32 %v1829_v5, %v1444_v60  ;;  %2259 = vmatprep.subr.bf16.mxu1 %v2258_v2 }
 0x2fd   : > { %2261 = vmatpush1.bf16.msra.mxu1 %v2260_v63 }
 0x2fe   : > { %v1833_v6 = vpop.f32.mrb[70].mxu0 }
 0x2ff   : > { %v1900_v7 = vmul.f32 %v1833_v6, %v1448_v62  ;;  %v1835_v8 = vpop.f32.mrb[71].mxu0 }
 0x300   : > { %v1901_v47 = vmul.f32 %v1835_v8, %v1450_v0 }
 0x301   : > { %v2264_v10 = vpack.c.bf16 %v1900_v7, %v1898_v4 }
 0x302   : > { %v2262_v18 = vpack.c.bf16 %v1901_v47, %v1899_v17 }
 0x304   : > { %2263 = vmatprep.subr.bf16.mxu1 %v2262_v18 }
 0x305   : > { %2265 = vmatpush1.bf16.msra.mxu1 %v2264_v10 }
 0x308   : > { %1967 = vmatmul.mubr.f32.vlgmr.msra.gmra.mrb[66].mxu1 %v627_v19 }
 0x3db   : > { %v1968_v33 = vpop.f32.mrb[66].mxu1 }
 0x3dc   : > { %v1974_v35 = vsel %vm1973_vm9, %v1968_v33, %v1060_v32  ;;  %v1970_v37 = vpop.f32.mrb[67].mxu1 }
 0x3dd   : > { %v1975_v38 = vsel %vm1973_vm9, %v1970_v37, %v1067_v31 }
 0x3de   : > { %v1978_v13 = vcombine.low %v1974_v35, %v1975_v38 }
 0x3e0   : > { %2171 = vst.sshfl [vmem:[%s365_s10] sm:$0x33 pattern:$0x76325410] %v1978_v13 }
 0x3e1 PF: > { %s20_s30 = sadd.s32 1, %s2305_s30  }
 0x3e2   : > { %p17_p4 = scmp.ge.s32.totalorder %s20_s30, 4  }
 0x3e4   :  { %19 = sbr.rel (!%p17_p4) target bundleno = 1 (0x1), region = 97 }

</bundles_post_ra>
